<compile_context>
chip_gen: v6e
topology: v6e:2x2x1
jax: 0.10.0
libtpu: 0.0.40
codegen_flags: <defaults>
</compile_context>

<pallas_src>
import functools

import jax
import jax.numpy as jnp
from jax import lax
from jax.experimental import pallas as pl
from jax.experimental.pallas import tpu as pltpu


def _intra_attention_kernel(x_ref, gamma_ref, beta_ref, wqkv_ref, wout_ref,
                            o_ref, *, eps: float, heads: int, dim_head: int,
                            flatten_attn: bool):
    bt, n, d = x_ref.shape                      # (batch-tile, tokens, feature)
    inner = heads * dim_head
    m_rows = bt * n
    mxu_dtype = wqkv_ref.dtype                  # bf16 by default (f32 optional)

    # ---- LayerNorm (f32) over the flattened (bt*N, D) row slab ----
    x = x_ref[...].reshape(m_rows, d)
    mu = jnp.mean(x, axis=-1, keepdims=True)
    xc = x - mu
    var = jnp.mean(xc * xc, axis=-1, keepdims=True)
    xn = xc * lax.rsqrt(var + eps)
    xn = xn * gamma_ref[...] + beta_ref[...]                        # (M, D) f32

    # ---- fused q/k/v projection: ONE lane-dense (M, 3*inner) matmul ----
    # (the dh**-0.5 softmax scale is already folded into the q columns)
    qkv = jnp.dot(xn.astype(mxu_dtype), wqkv_ref[...],
                  preferred_element_type=mxu_dtype)                 # (M, 3*inner)

    same = None
    if flatten_attn and bt > 1:
        # Block-diagonal validity mask built in-kernel from tiny batch-id iotas
        # (no (M,M) HBM bias, no double-buffered VMEM copy of it).
        row_id = lax.broadcasted_iota(jnp.int32, (m_rows, 1), 0)
        col_id = lax.broadcasted_iota(jnp.int32, (1, m_rows), 1)
        if n & (n - 1) == 0:                    # power-of-two token count -> shift
            shift = n.bit_length() - 1
            same = (row_id >> shift) == (col_id >> shift)
        else:
            same = (row_id // n) == (col_id // n)

    qkv_b = None if flatten_attn else qkv.reshape(bt, n, 3 * inner)

    acc = jnp.zeros((m_rows, d), jnp.float32)
    # TODO(synk): for large `heads` configs move heads onto a second ("arbitrary")
    # grid axis with per-head weight blocking instead of this unrolled loop.
    for h in range(heads):
        q0 = h * dim_head
        k0 = inner + h * dim_head
        v0 = 2 * inner + h * dim_head

        if flatten_attn:
            q_h = qkv[:, q0:q0 + dim_head]
            k_h = qkv[:, k0:k0 + dim_head]
            v_h = qkv[:, v0:v0 + dim_head]
            # Contract last dims -> K stays untransposed (no XLU transpose).
            s = lax.dot_general(q_h, k_h,
                                dimension_numbers=(((1,), (1,)), ((), ())),
                                preferred_element_type=jnp.float32)  # (M, M) f32
            if bt > 1:
                s = jnp.where(same, s, -1e30)   # f32 scores -> exp underflows to 0
        else:
            q_h = qkv_b[..., q0:q0 + dim_head]
            k_h = qkv_b[..., k0:k0 + dim_head]
            v_h = qkv_b[..., v0:v0 + dim_head]
            s = lax.dot_general(q_h, k_h,
                                dimension_numbers=(((2,), (2,)), ((0,), (0,))),
                                preferred_element_type=jnp.float32)  # (bt, n, n)

        # Numerically stable softmax; exp stays f32 (v5e-safe).
        smax = jnp.max(s, axis=-1, keepdims=True)
        p = jnp.exp(s - smax)
        denom = jnp.sum(p, axis=-1, keepdims=True)

        if flatten_attn:
            oh = jnp.dot(p.astype(mxu_dtype), v_h,
                         preferred_element_type=jnp.float32)          # (M, dh)
            oh = oh * pl.reciprocal(denom, approx=True)               # EUP slot
        else:
            oh = lax.dot_general(p.astype(mxu_dtype), v_h,
                                 dimension_numbers=(((2,), (1,)), ((0,), (0,))),
                                 preferred_element_type=jnp.float32)  # (bt, n, dh)
            oh = (oh * pl.reciprocal(denom, approx=True)).reshape(m_rows, dim_head)

        # Output projection decomposed per head and accumulated (no concat).
        wo = wout_ref[h * dim_head:(h + 1) * dim_head, :]             # (dh, D)
        acc = acc + jnp.dot(oh.astype(mxu_dtype), wo,
                            preferred_element_type=jnp.float32)       # (M, D)

    o_ref[...] = acc.reshape(bt, n, d).astype(o_ref.dtype)


def _estimate_vmem_bytes(bt, n, d, inner, mxu_itemsize, flatten):
    """Rough per-step VMEM requirement (tiles + weights + live temporaries)."""
    m = bt * n
    f32 = 4
    io = 2 * 2 * bt * n * d * f32                              # x + out, x2 buffers
    weights = 2 * (d * 3 * inner + inner * d) * mxu_itemsize + 2 * 2 * d * f32
    score = m * m if flatten else bt * n * n
    tmp = 3 * score * f32 + m * 3 * inner * mxu_itemsize + 4 * m * d * f32
    return io + weights + tmp


def _pick_batch_tile(batch, n_tokens, d, inner, mxu_itemsize, flatten,
                     target_rows, vmem_budget):
    """Largest bt dividing B with bt*N <= target_rows and fitting the VMEM budget.
    No forced 2-step cap (v5e/v6e are single-TC); on v7x pass a smaller
    target_rows / explicit batch_tile to keep >= 2 grid steps."""
    bt = max(1, min(batch, target_rows // max(n_tokens, 1)))
    while batch % bt:
        bt -= 1
    while bt > 1 and _estimate_vmem_bytes(bt, n_tokens, d, inner, mxu_itemsize,
                                          flatten) > vmem_budget:
        bt -= 1
        while batch % bt:
            bt -= 1
    return bt


def prepare_params(gamma, beta, w_qkv, w_out, *, heads, dim_head,
                   mxu_dtype=jnp.bfloat16):
    """One-time parameter prep (hoisted out of the per-call path):
    fold the dh**-0.5 softmax scale into the q columns of W_qkv and cast the
    projection weights to the MXU operand dtype (bf16 by default)."""
    d = w_qkv.shape[0]
    inner = heads * dim_head
    assert w_qkv.shape == (d, 3 * inner)
    assert w_out.shape == (inner, d)
    scale = float(dim_head) ** -0.5
    w_qkv = jnp.asarray(w_qkv)
    w_qkv_scaled = w_qkv.at[:, :inner].multiply(scale)
    return dict(
        gamma=jnp.asarray(gamma, jnp.float32).reshape(1, d),
        beta=jnp.asarray(beta, jnp.float32).reshape(1, d),
        w_qkv=w_qkv_scaled.astype(mxu_dtype),
        w_out=jnp.asarray(w_out).astype(mxu_dtype),
    )


def intra_attention(x, params, *, heads, dim_head, batch_tile=None,
                    target_rows=256):
    """x: (B, N, D) float32; params from prepare_params (weights in y = x @ W form)."""
    B, N, D = x.shape
    inner = heads * dim_head
    gamma, beta = params["gamma"], params["beta"]
    w_qkv, w_out = params["w_qkv"], params["w_out"]
    assert w_qkv.shape == (D, 3 * inner) and w_out.shape == (inner, D)

    mxu_itemsize = jnp.dtype(w_qkv.dtype).itemsize
    # Flatten+mask only pays off for short token counts; otherwise use batched
    # per-batch (bt, N, N) scores so no MXU/EUP work is spent on masked entries.
    flatten_attn = N < 128

    try:
        cap = int(pltpu.get_tpu_info().vmem_capacity_bytes)
    except Exception:  # pragma: no cover - conservative fallback (v7x per-TC)
        cap = 64 * 1024 * 1024
    budget = cap * 3 // 4

    if batch_tile is None:
        bt = _pick_batch_tile(B, N, D, inner, mxu_itemsize, flatten_attn,
                              target_rows, budget)
    else:
        bt = batch_tile
    assert B % bt == 0, "batch tile must divide batch"

    need = _estimate_vmem_bytes(bt, N, D, inner, mxu_itemsize, flatten_attn)
    vmem_limit = int(min(budget, max(32 * 1024 * 1024, 2 * need)))

    kernel = functools.partial(_intra_attention_kernel, eps=1e-5, heads=heads,
                               dim_head=dim_head, flatten_attn=flatten_attn)

    # Note: constant-index params (gamma/beta/weights) could be marked
    # pipeline_mode=pl.Buffered(1) to drop their second VMEM buffer; left at the
    # default here for maximum compatibility.
    return pl.pallas_call(
        kernel,
        out_shape=jax.ShapeDtypeStruct((B, N, D), x.dtype),
        grid_spec=pltpu.PrefetchScalarGridSpec(
            num_scalar_prefetch=0,
            grid=(B // bt,),
            in_specs=[
                pl.BlockSpec((bt, N, D), lambda i: (i, 0, 0)),       # x tile
                pl.BlockSpec((1, D), lambda i: (0, 0)),              # LN gamma
                pl.BlockSpec((1, D), lambda i: (0, 0)),              # LN beta
                pl.BlockSpec((D, 3 * inner), lambda i: (0, 0)),      # fused W_qkv (scale folded)
                pl.BlockSpec((inner, D), lambda i: (0, 0)),          # W_out
            ],
            out_specs=pl.BlockSpec((bt, N, D), lambda i: (i, 0, 0)),
        ),
        compiler_params=pltpu.CompilerParams(
            dimension_semantics=("parallel",),
            vmem_limit_bytes=vmem_limit),
    )(x, gamma, beta, w_qkv, w_out)


def intra_attention_ref(x, gamma, beta, w_qkv, w_out, *, heads, dim_head):
    """Pure-JAX reference mirroring the PyTorch forward."""
    B, N, D = x.shape
    inner_dim = heads * dim_head
    mean = jnp.mean(x, axis=-1, keepdims=True)
    var = jnp.mean((x - mean) ** 2, axis=-1, keepdims=True)
    xn = (x - mean) / jnp.sqrt(var + 1e-5) * gamma + beta
    qkv = xn @ w_qkv
    q, k, v = jnp.split(qkv, 3, axis=-1)

    def to_heads(t):  # b n (h d) -> b h n d
        return t.reshape(B, N, heads, dim_head).transpose(0, 2, 1, 3)

    q, k, v = map(to_heads, (q, k, v))
    dots = jnp.einsum("bhnd,bhmd->bhnm", q, k) * (dim_head ** -0.5)
    attn = jax.nn.softmax(dots, axis=-1)
    out = jnp.einsum("bhnm,bhmd->bhnd", attn, v)
    out = out.transpose(0, 2, 1, 3).reshape(B, N, inner_dim)
    return out @ w_out


if __name__ == "__main__":
    # Small, deterministic setup consistent with the module's __init__.
    B, N, dim = 8, 8, 32
    heads, dim_head = 4, 16
    inner_dim = heads * dim_head

    key = jax.random.PRNGKey(0)
    kx, kqkv, kout, kg, kb = jax.random.split(key, 5)

    x = jax.random.normal(kx, (B, N, dim), dtype=jnp.float32)
    gamma = 1.0 + 0.05 * jax.random.normal(kg, (dim,), dtype=jnp.float32)  # LN weight
    beta = 0.05 * jax.random.normal(kb, (dim,), dtype=jnp.float32)         # LN bias
    # Linear weights in y = x @ W form (transpose of torch Linear.weight layout).
    w_qkv = (jax.random.normal(kqkv, (dim, 3 * inner_dim), dtype=jnp.float32)
             * (1.0 / jnp.sqrt(dim)))
    w_out = (jax.random.normal(kout, (inner_dim, dim), dtype=jnp.float32)
             * (1.0 / jnp.sqrt(inner_dim)))

    ref = intra_attention_ref(x, gamma, beta, w_qkv, w_out,
                              heads=heads, dim_head=dim_head)

    # f32 MXU-operand path (tight-ish tolerance; approx reciprocal on softmax denom).
    params_f32 = prepare_params(gamma, beta, w_qkv, w_out,
                                heads=heads, dim_head=dim_head,
                                mxu_dtype=jnp.float32)
    out_f32 = jax.block_until_ready(
        intra_attention(x, params_f32, heads=heads, dim_head=dim_head))
    assert out_f32.shape == (B, N, dim)
    assert jnp.allclose(out_f32, ref, atol=3e-2, rtol=3e-2), \
        "f32 kernel mismatch vs reference"

    # Default bf16 MXU-operand path (f32 accumulation) — looser tolerance.
    params_bf16 = prepare_params(gamma, beta, w_qkv, w_out,
                                 heads=heads, dim_head=dim_head)
    out_bf16 = jax.block_until_ready(
        intra_attention(x, params_bf16, heads=heads, dim_head=dim_head))
    assert out_bf16.shape == (B, N, dim)
    assert jnp.allclose(out_bf16, ref, atol=2e-1, rtol=2e-1), \
        "bf16 kernel mismatch vs reference"

    print("KERNEL_OK")
</pallas_src>

<mosaic_0001>
module attributes {stable_mosaic.version = 11 : i64} {
  func.func @_intra_attention_kernel(%arg0: i32, %arg1: memref<8x8x32xf32, #tpu.memory_space<vmem>>, %arg2: memref<1x32xf32, #tpu.memory_space<vmem>>, %arg3: memref<1x32xf32, #tpu.memory_space<vmem>>, %arg4: memref<32x192xf32, #tpu.memory_space<vmem>>, %arg5: memref<64x32xf32, #tpu.memory_space<vmem>>, %arg6: memref<8x8x32xf32, #tpu.memory_space<vmem>>) attributes {dimension_semantics = [#tpu.dimension_semantics<parallel>], iteration_bounds = array<i64: 1>, scalar_prefetch = 0 : i64, scratch_operands = 0 : i64, tpu.core_type = #tpu.core_type<tc>, window_params = [{transform_indices = @transform_0, window_bounds = array<i64: 8, 8, 32>}, {pipeline_mode = #tpu.pipeline_mode<synchronous>, transform_indices = @transform_1, window_bounds = array<i64: 1, 32>}, {pipeline_mode = #tpu.pipeline_mode<synchronous>, transform_indices = @transform_2, window_bounds = array<i64: 1, 32>}, {pipeline_mode = #tpu.pipeline_mode<synchronous>, transform_indices = @transform_3, window_bounds = array<i64: 32, 192>}, {pipeline_mode = #tpu.pipeline_mode<synchronous>, transform_indices = @transform_4, window_bounds = array<i64: 64, 32>}, {transform_indices = @transform_5, window_bounds = array<i64: 8, 8, 32>}]} {
    %c0 = arith.constant 0 : index
    %c0_0 = arith.constant 0 : index
    %c0_1 = arith.constant 0 : index
    %0 = vector.load %arg1[%c0, %c0_0, %c0_1] : memref<8x8x32xf32, #tpu.memory_space<vmem>>, vector<8x8x32xf32>
    %1 = vector.shape_cast %0 : vector<8x8x32xf32> to vector<64x32xf32>
    %cst = arith.constant dense<0.000000e+00> : vector<64xf32>
    %2 = vector.multi_reduction <add>, %1, %cst [1] : vector<64x32xf32> to vector<64xf32>
    %3 = vector.shape_cast %2 : vector<64xf32> to vector<64x1xf32>
    %cst_2 = arith.constant 3.200000e+01 : f32
    %4 = vector.broadcast %cst_2 : f32 to vector<64x1xf32>
    %5 = arith.divf %3, %4 : vector<64x1xf32>
    %6 = vector.broadcast %5 : vector<64x1xf32> to vector<64x32xf32>
    %7 = arith.subf %1, %6 : vector<64x32xf32>
    %8 = arith.mulf %7, %7 : vector<64x32xf32>
    %cst_3 = arith.constant dense<0.000000e+00> : vector<64xf32>
    %9 = vector.multi_reduction <add>, %8, %cst_3 [1] : vector<64x32xf32> to vector<64xf32>
    %10 = vector.shape_cast %9 : vector<64xf32> to vector<64x1xf32>
    %cst_4 = arith.constant 3.200000e+01 : f32
    %11 = vector.broadcast %cst_4 : f32 to vector<64x1xf32>
    %12 = arith.divf %10, %11 : vector<64x1xf32>
    %cst_5 = arith.constant 9.99999974E-6 : f32
    %13 = vector.broadcast %cst_5 : f32 to vector<64x1xf32>
    %14 = arith.addf %12, %13 : vector<64x1xf32>
    %15 = math.rsqrt %14 : vector<64x1xf32>
    %16 = vector.broadcast %15 : vector<64x1xf32> to vector<64x32xf32>
    %17 = arith.mulf %7, %16 : vector<64x32xf32>
    %c0_6 = arith.constant 0 : index
    %c0_7 = arith.constant 0 : index
    %18 = vector.load %arg2[%c0_6, %c0_7] : memref<1x32xf32, #tpu.memory_space<vmem>>, vector<1x32xf32>
    %19 = vector.broadcast %18 : vector<1x32xf32> to vector<64x32xf32>
    %20 = arith.mulf %17, %19 : vector<64x32xf32>
    %c0_8 = arith.constant 0 : index
    %c0_9 = arith.constant 0 : index
    %21 = vector.load %arg3[%c0_8, %c0_9] : memref<1x32xf32, #tpu.memory_space<vmem>>, vector<1x32xf32>
    %22 = vector.broadcast %21 : vector<1x32xf32> to vector<64x32xf32>
    %23 = arith.addf %20, %22 : vector<64x32xf32>
    %c0_10 = arith.constant 0 : index
    %c0_11 = arith.constant 0 : index
    %24 = vector.load %arg4[%c0_10, %c0_11] : memref<32x192xf32, #tpu.memory_space<vmem>>, vector<32x192xf32>
    %cst_12 = arith.constant dense<0.000000e+00> : vector<64x192xf32>
    %25 = tpu.matmul %23, %24, %cst_12 {dimension_numbers = #tpu.dot_dimension_numbers<[1], [0], [0], [1], [0, 0, 1, 1], [], []>} : vector<64x32xf32>, vector<32x192xf32>, vector<64x192xf32> -> vector<64x192xf32>
    %26 = tpu.iota {dimensions = array<i32: 0>} : vector<64x1xi32>
    %27 = tpu.iota {dimensions = array<i32: 1>} : vector<1x64xi32>
    %c3_i32 = arith.constant 3 : i32
    %28 = vector.broadcast %c3_i32 : i32 to vector<64x1xi32>
    %29 = arith.shrsi %26, %28 : vector<64x1xi32>
    %c3_i32_13 = arith.constant 3 : i32
    %30 = vector.broadcast %c3_i32_13 : i32 to vector<1x64xi32>
    %31 = arith.shrsi %27, %30 : vector<1x64xi32>
    %32 = vector.broadcast %29 : vector<64x1xi32> to vector<64x64xi32>
    %33 = vector.broadcast %31 : vector<1x64xi32> to vector<64x64xi32>
    %34 = arith.cmpi eq, %32, %33 : vector<64x64xi32>
    %cst_14 = arith.constant 0.000000e+00 : f32
    %35 = vector.broadcast %cst_14 : f32 to vector<64x32xf32>
    %36 = vector.extract_strided_slice %25 {offsets = [0, 0], sizes = [64, 16], strides = [1, 1]} : vector<64x192xf32> to vector<64x16xf32>
    %37 = vector.extract_strided_slice %25 {offsets = [0, 64], sizes = [64, 16], strides = [1, 1]} : vector<64x192xf32> to vector<64x16xf32>
    %38 = vector.extract_strided_slice %25 {offsets = [0, 128], sizes = [64, 16], strides = [1, 1]} : vector<64x192xf32> to vector<64x16xf32>
    %cst_15 = arith.constant dense<0.000000e+00> : vector<64x64xf32>
    %39 = tpu.matmul %36, %37, %cst_15 {dimension_numbers = #tpu.dot_dimension_numbers<[1], [1], [0], [0], [0, 0, 1, 0], [], []>} : vector<64x16xf32>, vector<64x16xf32>, vector<64x64xf32> -> vector<64x64xf32>
    %cst_16 = arith.constant -1.000000e+30 : f32
    %40 = vector.broadcast %cst_16 : f32 to vector<64x64xf32>
    %41 = arith.select %34, %39, %40 : vector<64x64xi1>, vector<64x64xf32>
    %cst_17 = arith.constant dense<0xFF800000> : vector<64xf32>
    %42 = vector.multi_reduction <maximumf>, %41, %cst_17 [1] : vector<64x64xf32> to vector<64xf32>
    %43 = vector.shape_cast %42 : vector<64xf32> to vector<64x1xf32>
    %44 = vector.broadcast %43 : vector<64x1xf32> to vector<64x64xf32>
    %45 = arith.subf %41, %44 : vector<64x64xf32>
    %46 = math.exp %45 : vector<64x64xf32>
    %cst_18 = arith.constant dense<0.000000e+00> : vector<64xf32>
    %47 = vector.multi_reduction <add>, %46, %cst_18 [1] : vector<64x64xf32> to vector<64xf32>
    %48 = vector.shape_cast %47 : vector<64xf32> to vector<64x1xf32>
    %cst_19 = arith.constant dense<0.000000e+00> : vector<64x16xf32>
    %49 = tpu.matmul %46, %38, %cst_19 {dimension_numbers = #tpu.dot_dimension_numbers<[1], [0], [0], [1], [0, 0, 1, 1], [], []>} : vector<64x64xf32>, vector<64x16xf32>, vector<64x16xf32> -> vector<64x16xf32>
    %50 = tpu.reciprocal %48 {approx = true} : vector<64x1xf32> -> vector<64x1xf32>
    %51 = vector.broadcast %50 : vector<64x1xf32> to vector<64x16xf32>
    %52 = arith.mulf %49, %51 : vector<64x16xf32>
    %c0_20 = arith.constant 0 : index
    %c0_21 = arith.constant 0 : index
    %53 = vector.load %arg5[%c0_20, %c0_21] : memref<64x32xf32, #tpu.memory_space<vmem>>, vector<16x32xf32>
    %cst_22 = arith.constant dense<0.000000e+00> : vector<64x32xf32>
    %54 = tpu.matmul %52, %53, %cst_22 {dimension_numbers = #tpu.dot_dimension_numbers<[1], [0], [0], [1], [0, 0, 1, 1], [], []>} : vector<64x16xf32>, vector<16x32xf32>, vector<64x32xf32> -> vector<64x32xf32>
    %55 = arith.addf %35, %54 : vector<64x32xf32>
    %56 = vector.extract_strided_slice %25 {offsets = [0, 16], sizes = [64, 16], strides = [1, 1]} : vector<64x192xf32> to vector<64x16xf32>
    %57 = vector.extract_strided_slice %25 {offsets = [0, 80], sizes = [64, 16], strides = [1, 1]} : vector<64x192xf32> to vector<64x16xf32>
    %58 = vector.extract_strided_slice %25 {offsets = [0, 144], sizes = [64, 16], strides = [1, 1]} : vector<64x192xf32> to vector<64x16xf32>
    %cst_23 = arith.constant dense<0.000000e+00> : vector<64x64xf32>
    %59 = tpu.matmul %56, %57, %cst_23 {dimension_numbers = #tpu.dot_dimension_numbers<[1], [1], [0], [0], [0, 0, 1, 0], [], []>} : vector<64x16xf32>, vector<64x16xf32>, vector<64x64xf32> -> vector<64x64xf32>
    %cst_24 = arith.constant -1.000000e+30 : f32
    %60 = vector.broadcast %cst_24 : f32 to vector<64x64xf32>
    %61 = arith.select %34, %59, %60 : vector<64x64xi1>, vector<64x64xf32>
    %cst_25 = arith.constant dense<0xFF800000> : vector<64xf32>
    %62 = vector.multi_reduction <maximumf>, %61, %cst_25 [1] : vector<64x64xf32> to vector<64xf32>
    %63 = vector.shape_cast %62 : vector<64xf32> to vector<64x1xf32>
    %64 = vector.broadcast %63 : vector<64x1xf32> to vector<64x64xf32>
    %65 = arith.subf %61, %64 : vector<64x64xf32>
    %66 = math.exp %65 : vector<64x64xf32>
    %cst_26 = arith.constant dense<0.000000e+00> : vector<64xf32>
    %67 = vector.multi_reduction <add>, %66, %cst_26 [1] : vector<64x64xf32> to vector<64xf32>
    %68 = vector.shape_cast %67 : vector<64xf32> to vector<64x1xf32>
    %cst_27 = arith.constant dense<0.000000e+00> : vector<64x16xf32>
    %69 = tpu.matmul %66, %58, %cst_27 {dimension_numbers = #tpu.dot_dimension_numbers<[1], [0], [0], [1], [0, 0, 1, 1], [], []>} : vector<64x64xf32>, vector<64x16xf32>, vector<64x16xf32> -> vector<64x16xf32>
    %70 = tpu.reciprocal %68 {approx = true} : vector<64x1xf32> -> vector<64x1xf32>
    %71 = vector.broadcast %70 : vector<64x1xf32> to vector<64x16xf32>
    %72 = arith.mulf %69, %71 : vector<64x16xf32>
    %c16 = arith.constant 16 : index
    %c0_28 = arith.constant 0 : index
    %73 = vector.load %arg5[%c16, %c0_28] : memref<64x32xf32, #tpu.memory_space<vmem>>, vector<16x32xf32>
    %cst_29 = arith.constant dense<0.000000e+00> : vector<64x32xf32>
    %74 = tpu.matmul %72, %73, %cst_29 {dimension_numbers = #tpu.dot_dimension_numbers<[1], [0], [0], [1], [0, 0, 1, 1], [], []>} : vector<64x16xf32>, vector<16x32xf32>, vector<64x32xf32> -> vector<64x32xf32>
    %75 = arith.addf %55, %74 : vector<64x32xf32>
    %76 = vector.extract_strided_slice %25 {offsets = [0, 32], sizes = [64, 16], strides = [1, 1]} : vector<64x192xf32> to vector<64x16xf32>
    %77 = vector.extract_strided_slice %25 {offsets = [0, 96], sizes = [64, 16], strides = [1, 1]} : vector<64x192xf32> to vector<64x16xf32>
    %78 = vector.extract_strided_slice %25 {offsets = [0, 160], sizes = [64, 16], strides = [1, 1]} : vector<64x192xf32> to vector<64x16xf32>
    %cst_30 = arith.constant dense<0.000000e+00> : vector<64x64xf32>
    %79 = tpu.matmul %76, %77, %cst_30 {dimension_numbers = #tpu.dot_dimension_numbers<[1], [1], [0], [0], [0, 0, 1, 0], [], []>} : vector<64x16xf32>, vector<64x16xf32>, vector<64x64xf32> -> vector<64x64xf32>
    %cst_31 = arith.constant -1.000000e+30 : f32
    %80 = vector.broadcast %cst_31 : f32 to vector<64x64xf32>
    %81 = arith.select %34, %79, %80 : vector<64x64xi1>, vector<64x64xf32>
    %cst_32 = arith.constant dense<0xFF800000> : vector<64xf32>
    %82 = vector.multi_reduction <maximumf>, %81, %cst_32 [1] : vector<64x64xf32> to vector<64xf32>
    %83 = vector.shape_cast %82 : vector<64xf32> to vector<64x1xf32>
    %84 = vector.broadcast %83 : vector<64x1xf32> to vector<64x64xf32>
    %85 = arith.subf %81, %84 : vector<64x64xf32>
    %86 = math.exp %85 : vector<64x64xf32>
    %cst_33 = arith.constant dense<0.000000e+00> : vector<64xf32>
    %87 = vector.multi_reduction <add>, %86, %cst_33 [1] : vector<64x64xf32> to vector<64xf32>
    %88 = vector.shape_cast %87 : vector<64xf32> to vector<64x1xf32>
    %cst_34 = arith.constant dense<0.000000e+00> : vector<64x16xf32>
    %89 = tpu.matmul %86, %78, %cst_34 {dimension_numbers = #tpu.dot_dimension_numbers<[1], [0], [0], [1], [0, 0, 1, 1], [], []>} : vector<64x64xf32>, vector<64x16xf32>, vector<64x16xf32> -> vector<64x16xf32>
    %90 = tpu.reciprocal %88 {approx = true} : vector<64x1xf32> -> vector<64x1xf32>
    %91 = vector.broadcast %90 : vector<64x1xf32> to vector<64x16xf32>
    %92 = arith.mulf %89, %91 : vector<64x16xf32>
    %c32 = arith.constant 32 : index
    %c0_35 = arith.constant 0 : index
    %93 = vector.load %arg5[%c32, %c0_35] : memref<64x32xf32, #tpu.memory_space<vmem>>, vector<16x32xf32>
    %cst_36 = arith.constant dense<0.000000e+00> : vector<64x32xf32>
    %94 = tpu.matmul %92, %93, %cst_36 {dimension_numbers = #tpu.dot_dimension_numbers<[1], [0], [0], [1], [0, 0, 1, 1], [], []>} : vector<64x16xf32>, vector<16x32xf32>, vector<64x32xf32> -> vector<64x32xf32>
    %95 = arith.addf %75, %94 : vector<64x32xf32>
    %96 = vector.extract_strided_slice %25 {offsets = [0, 48], sizes = [64, 16], strides = [1, 1]} : vector<64x192xf32> to vector<64x16xf32>
    %97 = vector.extract_strided_slice %25 {offsets = [0, 112], sizes = [64, 16], strides = [1, 1]} : vector<64x192xf32> to vector<64x16xf32>
    %98 = vector.extract_strided_slice %25 {offsets = [0, 176], sizes = [64, 16], strides = [1, 1]} : vector<64x192xf32> to vector<64x16xf32>
    %cst_37 = arith.constant dense<0.000000e+00> : vector<64x64xf32>
    %99 = tpu.matmul %96, %97, %cst_37 {dimension_numbers = #tpu.dot_dimension_numbers<[1], [1], [0], [0], [0, 0, 1, 0], [], []>} : vector<64x16xf32>, vector<64x16xf32>, vector<64x64xf32> -> vector<64x64xf32>
    %cst_38 = arith.constant -1.000000e+30 : f32
    %100 = vector.broadcast %cst_38 : f32 to vector<64x64xf32>
    %101 = arith.select %34, %99, %100 : vector<64x64xi1>, vector<64x64xf32>
    %cst_39 = arith.constant dense<0xFF800000> : vector<64xf32>
    %102 = vector.multi_reduction <maximumf>, %101, %cst_39 [1] : vector<64x64xf32> to vector<64xf32>
    %103 = vector.shape_cast %102 : vector<64xf32> to vector<64x1xf32>
    %104 = vector.broadcast %103 : vector<64x1xf32> to vector<64x64xf32>
    %105 = arith.subf %101, %104 : vector<64x64xf32>
    %106 = math.exp %105 : vector<64x64xf32>
    %cst_40 = arith.constant dense<0.000000e+00> : vector<64xf32>
    %107 = vector.multi_reduction <add>, %106, %cst_40 [1] : vector<64x64xf32> to vector<64xf32>
    %108 = vector.shape_cast %107 : vector<64xf32> to vector<64x1xf32>
    %cst_41 = arith.constant dense<0.000000e+00> : vector<64x16xf32>
    %109 = tpu.matmul %106, %98, %cst_41 {dimension_numbers = #tpu.dot_dimension_numbers<[1], [0], [0], [1], [0, 0, 1, 1], [], []>} : vector<64x64xf32>, vector<64x16xf32>, vector<64x16xf32> -> vector<64x16xf32>
    %110 = tpu.reciprocal %108 {approx = true} : vector<64x1xf32> -> vector<64x1xf32>
    %111 = vector.broadcast %110 : vector<64x1xf32> to vector<64x16xf32>
    %112 = arith.mulf %109, %111 : vector<64x16xf32>
    %c48 = arith.constant 48 : index
    %c0_42 = arith.constant 0 : index
    %113 = vector.load %arg5[%c48, %c0_42] : memref<64x32xf32, #tpu.memory_space<vmem>>, vector<16x32xf32>
    %cst_43 = arith.constant dense<0.000000e+00> : vector<64x32xf32>
    %114 = tpu.matmul %112, %113, %cst_43 {dimension_numbers = #tpu.dot_dimension_numbers<[1], [0], [0], [1], [0, 0, 1, 1], [], []>} : vector<64x16xf32>, vector<16x32xf32>, vector<64x32xf32> -> vector<64x32xf32>
    %115 = arith.addf %95, %114 : vector<64x32xf32>
    %116 = vector.shape_cast %115 : vector<64x32xf32> to vector<8x8x32xf32>
    %c0_44 = arith.constant 0 : index
    %c0_45 = arith.constant 0 : index
    %c0_46 = arith.constant 0 : index
    %117 = vector.load %arg6[%c0_44, %c0_45, %c0_46] : memref<8x8x32xf32, #tpu.memory_space<vmem>>, vector<8x8x32xf32>
    tpu.vector_store %arg6[%c0_44, %c0_45, %c0_46], %116 {strides = array<i32>} : memref<8x8x32xf32, #tpu.memory_space<vmem>>, vector<8x8x32xf32>,
    return
  }
  func.func @transform_0(%arg0: i32) -> (i32, i32, i32) {
    %c0_i32 = arith.constant 0 : i32
    %c0_i32_0 = arith.constant 0 : i32
    %c0_i32_1 = arith.constant 0 : i32
    return %arg0, %c0_i32, %c0_i32_0 : i32, i32, i32
  }
  func.func @transform_1(%arg0: i32) -> (i32, i32) {
    %c0_i32 = arith.constant 0 : i32
    %c0_i32_0 = arith.constant 0 : i32
    %c0_i32_1 = arith.constant 0 : i32
    return %c0_i32, %c0_i32_0 : i32, i32
  }
  func.func @transform_2(%arg0: i32) -> (i32, i32) {
    %c0_i32 = arith.constant 0 : i32
    %c0_i32_0 = arith.constant 0 : i32
    %c0_i32_1 = arith.constant 0 : i32
    return %c0_i32, %c0_i32_0 : i32, i32
  }
  func.func @transform_3(%arg0: i32) -> (i32, i32) {
    %c0_i32 = arith.constant 0 : i32
    %c0_i32_0 = arith.constant 0 : i32
    %c0_i32_1 = arith.constant 0 : i32
    return %c0_i32, %c0_i32_0 : i32, i32
  }
  func.func @transform_4(%arg0: i32) -> (i32, i32) {
    %c0_i32 = arith.constant 0 : i32
    %c0_i32_0 = arith.constant 0 : i32
    %c0_i32_1 = arith.constant 0 : i32
    return %c0_i32, %c0_i32_0 : i32, i32
  }
  func.func @transform_5(%arg0: i32) -> (i32, i32, i32) {
    %c0_i32 = arith.constant 0 : i32
    %c0_i32_0 = arith.constant 0 : i32
    %c0_i32_1 = arith.constant 0 : i32
    return %arg0, %c0_i32, %c0_i32_0 : i32, i32, i32
  }
}

</mosaic_0001>

<bundles_post_ra>
// kernel: tpu_custom_call.1
= control target key start
LH: loop header
LB: loop body
LE: loop exit
PB: predicated region body
PF: predicated region fallthrough
CT: control target
= control target key end

     0   :  { %10 = vsyncpa [#allocation3], 0  ;;  %s4426_s0 = inlined_call_operand.vmem [shape: f32[8,8,32], index: 0, kind: input, shape index: {}]   ;;  %s4427_s1 = inlined_call_operand.vmem [shape: f32[1,32], index: 1, kind: input, shape index: {}]   ;;  %s4428_s2 = inlined_call_operand.vmem [shape: f32[1,32], index: 2, kind: input, shape index: {}]   ;;  %s4429_s3 = inlined_call_operand.hbm [shape: f32[32,192], index: 3, kind: input, shape index: {}]   ;;  %s4430_s4 = inlined_call_operand.vmem [shape: f32[64,32], index: 4, kind: input, shape index: {}]   ;;  %s4431_s5 = inlined_call_operand.hbm [shape: f32[8,8,32], index: 5, kind: output, shape index: {}]  }
   0x1   :  { %11 = vsyncpa [#allocation4], 0  ;;  %s3378_s18 = smov [#allocation2]  }
   0x2   :  { %s23_s19 = sshll.u32 %s3378_s18, 4  ;;  %s24_s19 = int_to_ptr.vmem [resolvable:$true] %s23_s19 }
   0x3   :  { %s3342_s20 = scalar_lea.vmem %s24_s19, 1024  ;;  %p3347_p1 = scmp.lt.s32.totalorder %s24_s19, %s24_s19 }
   0x4   :  { %p3343_p0 = scmp.ne.s32.totalorder %s24_s19, %s3342_s20  ;;  %p3348_p2 = scmp.lt.s32.totalorder %s3342_s20, %s3342_s20 }
   0x6   :  { %p3349_p3 = por %p3348_p2, %p3347_p1 }
   0x8   :  { %p3350_p4 = pnand %p3349_p3, %p3343_p0 }
   0xa   :  { %3353 = shalt.err (!%p3350_p4)
}
   0xb   :  { %s3379_s21 = smov 256   ;;  %s3380_s22 = smov 16  }
   0xc   :  { %29 = dma.hbm_to_vmem [thread:$0]  %s4429_s3, 1024, %s24_s19, [#allocation3], %s3379_s21, %s3379_s21, %s3380_s22  }
   0xd   :  { %3374 = dma.done.wait [#allocation3], 1024  }
   0xe   :  { %3375 = vsyncadd [#allocation3], 4294966272  ;;  %vm43_vm0 = vcmask 261120   ;;  %v35_v0 = vld [vmem:[%s4426_s0] sm:$0xff]  ;;  %v37_v1 = vld [vmem:[%s4426_s0 + $0x10] sm:$0xff]  ;;  %vm376_vm1 = vcmask 130048  }
   0xf   :  { %v36_v2 = vld [vmem:[%s4426_s0 + $0x8] sm:$0xff]  ;;  %v44_v3 = vsel %vm43_vm0, %v35_v0, 0.0  ;;  %v50_v4 = vsel %vm43_vm0, %v37_v1, 0.0  ;;  %v38_v5 = vld [vmem:[%s4426_s0 + $0x18] sm:$0xff]  ;;  %v39_v8 = vld [vmem:[%s4426_s0 + $0x20] sm:$0xff]  ;;  %s3384_s18 = smov 112  }
  0x10   :  { %45 = vadd.xlane.f32.xlu0 %v44_v3  ;;  %51 = vadd.xlane.f32.xlu1 %v50_v4  ;;  %v47_v6 = vsel %vm43_vm0, %v36_v2, 0.0  ;;  %v53_v7 = vsel %vm43_vm0, %v38_v5, 0.0  ;;  %v40_v9 = vld [vmem:[%s4426_s0 + $0x28] sm:$0xff]  ;;  %v56_v10 = vsel %vm43_vm0, %v39_v8, 0.0  ;;  %v41_v12 = vld [vmem:[%s4426_s0 + $0x30] sm:$0xff]  ;;  %v42_v13 = vld [vmem:[%s4426_s0 + $0x38] sm:$0xff] }
  0x11   :  { %v59_v11 = vsel %vm43_vm0, %v40_v9, 0.0  ;;  %v62_v14 = vsel %vm43_vm0, %v41_v12, 0.0  ;;  %v65_v15 = vsel %vm43_vm0, %v42_v13, 0.0  ;;  %v186_v56 = vld [vmem:[#allocation2 + $0x38] sm:$0xff]  ;;  %v185_v57 = vld [vmem:[#allocation2 + $0x30] sm:$0xff]  ;;  %v184_v58 = vld [vmem:[#allocation2 + $0x28] sm:$0xff] }
  0x12   :  { %235 = vmatprep.subr.mxu0 %v186_v56  ;;  %v183_v59 = vld [vmem:[#allocation2 + $0x20] sm:$0xff]  ;;  %v182_v60 = vld [vmem:[#allocation2 + $0x18] sm:$0xff]  ;;  %v181_v61 = vld [vmem:[#allocation2 + $0x10] sm:$0xff]  ;;  %vm522_vm3 = vcmask 523264   ;;  %s3385_s19 = smov 32   ;;  %s3386_s25 = smov 96  }
  0x13   :  { %236 = vmatpush1.msra.mxu0 %v185_v57  ;;  %v180_v62 = vld [vmem:[#allocation2 + $0x8] sm:$0xff]  ;;  %v179_v63 = vld [vmem:[#allocation2] sm:$0xff]  ;;  %s3387_s26 = smov 80  }
  0x14   :  { %48 = vadd.xlane.f32.xlu0 %v47_v6  ;;  %54 = vadd.xlane.f32.xlu1 %v53_v7 }
  0x15   :  { %237 = vmatprep.subr.mxu0 %v184_v58 }
  0x16   :  { %238 = vmatpush1.msra.mxu0 %v183_v59 }
  0x17   :  { %239 = vmatprep.subr.mxu0 %v182_v60 }
  0x18   :  { %57 = vadd.xlane.f32.xlu0 %v56_v10  ;;  %60 = vadd.xlane.f32.xlu1 %v59_v11 }
  0x19   :  { %240 = vmatpush1.msra.mxu0 %v181_v61 }
  0x1a   :  { %241 = vmatprep.subr.mxu0 %v180_v62 }
  0x1b   :  { %242 = vmatpush1.msra.mxu0 %v179_v63 }
  0x1c   :  { %63 = vadd.xlane.f32.xlu0 %v62_v14  ;;  %66 = vadd.xlane.f32.xlu1 %v65_v15 }
  0x99   :  { %v46_v16 = vpop.xlane.xlu0 %45  ;;  %v52_v17 = vpop.xlane.xlu1 %51 }
  0x9a   :  { %v69_v18 = vmul.f32 0.03125, %v46_v16  ;;  %v71_v19 = vmul.f32 0.03125, %v52_v17 }
  0x9c   :  { %v3457_v20 = vsub.f32 %v35_v0, %v69_v18  ;;  %v3459_v21 = vsub.f32 %v37_v1, %v71_v19  ;;  %v3381_v0 = vmov 0.0  }
  0x9d   :  { %v49_v22 = vpop.xlane.xlu0 %48  ;;  %v55_v23 = vpop.xlane.xlu1 %54  ;;  %275 = vmatprep.mubr.f32.mxu0 %v3381_v0 }
  0x9e   :  { %v70_v24 = vmul.f32 0.03125, %v49_v22  ;;  %v72_v25 = vmul.f32 0.03125, %v55_v23  ;;  %v85_v26 = vmul.f32 %v3457_v20, %v3457_v20  ;;  %v87_v27 = vmul.f32 %v3459_v21, %v3459_v21 }
  0xa0   :  { %v3465_v28 = vsub.f32 %v36_v2, %v70_v24  ;;  %v3467_v29 = vsub.f32 %v38_v5, %v72_v25  ;;  %v93_v30 = vsel %vm43_vm0, %v85_v26, 0.0  ;;  %v99_v33 = vsel %vm43_vm0, %v87_v27, 0.0  ;;  %v2567_v25 = vld [vmem:[%s4427_s1] ss:$0 sm:$0xff]  ;;  %s3382_s1 = smov 64  }
  0xa1   :  { %94 = vadd.xlane.f32.xlu0 %v93_v30  ;;  %v58_v31 = vpop.xlane.xlu0 %57  ;;  %v61_v32 = vpop.xlane.xlu1 %60 }
  0xa2   :  { %v73_v34 = vmul.f32 0.03125, %v58_v31  ;;  %v74_v35 = vmul.f32 0.03125, %v61_v32  ;;  %v86_v36 = vmul.f32 %v3465_v28, %v3465_v28  ;;  %v88_v37 = vmul.f32 %v3467_v29, %v3467_v29  ;;  %v2568_v31 = vld [vmem:[%s4428_s2] ss:$0 sm:$0xff]  ;;  %s3383_s2 = smov 48  }
  0xa4   :  { %v3475_v38 = vsub.f32 %v39_v8, %v73_v34  ;;  %v3477_v39 = vsub.f32 %v40_v9, %v74_v35  ;;  %v96_v40 = vsel %vm43_vm0, %v86_v36, 0.0  ;;  %v102_v43 = vsel %vm43_vm0, %v88_v37, 0.0 }
  0xa5   :  { %100 = vadd.xlane.f32.xlu0 %v99_v33  ;;  %97 = vadd.xlane.f32.xlu1 %v96_v40  ;;  %v64_v41 = vpop.xlane.xlu0 %63  ;;  %v67_v42 = vpop.xlane.xlu1 %66 }
  0xa6   :  { %v75_v44 = vmul.f32 0.03125, %v64_v41  ;;  %v76_v45 = vmul.f32 0.03125, %v67_v42  ;;  %v89_v46 = vmul.f32 %v3475_v38, %v3475_v38  ;;  %v90_v47 = vmul.f32 %v3477_v39, %v3477_v39 }
  0xa8   :  { %v3485_v48 = vsub.f32 %v41_v12, %v75_v44  ;;  %v3487_v49 = vsub.f32 %v42_v13, %v76_v45  ;;  %v105_v50 = vsel %vm43_vm0, %v89_v46, 0.0  ;;  %v108_v51 = vsel %vm43_vm0, %v90_v47, 0.0 }
  0xa9   :  { %103 = vadd.xlane.f32.xlu1 %v102_v43  ;;  %106 = vadd.xlane.f32.xlu0 %v105_v50 }
  0xaa   :  { %v91_v52 = vmul.f32 %v3485_v48, %v3485_v48  ;;  %v92_v53 = vmul.f32 %v3487_v49, %v3487_v49 }
  0xac   :  { %v111_v54 = vsel %vm43_vm0, %v91_v52, 0.0  ;;  %v114_v55 = vsel %vm43_vm0, %v92_v53, 0.0 }
  0xad   :  { %109 = vadd.xlane.f32.xlu1 %v108_v51  ;;  %112 = vadd.xlane.f32.xlu0 %v111_v54 }
  0xb1   :  { %115 = vadd.xlane.f32.xlu1 %v114_v55 }
 0x12a   :  { %v95_v1 = vpop.xlane.xlu0 %94 }
 0x12b   :  { %v117_v2 = vmul.f32 0.03125, %v95_v1 }
 0x12d   :  { %v125_v3 = vadd.f32 1e-05, %v117_v2 }
 0x12e   :  { %v98_v4 = vpop.xlane.xlu1 %97  ;;  %v101_v5 = vpop.xlane.xlu0 %100 }
 0x12f   :  { %3190 = vrsqrt.f32 %v125_v3  ;;  %v118_v6 = vmul.f32 0.03125, %v98_v4  ;;  %v119_v7 = vmul.f32 0.03125, %v101_v5 }
 0x131   :  { %v126_v8 = vadd.f32 1e-05, %v118_v6  ;;  %v127_v9 = vadd.f32 1e-05, %v119_v7 }
 0x132   :  { %v104_v10 = vpop.xlane.xlu1 %103  ;;  %v107_v11 = vpop.xlane.xlu0 %106 }
 0x133   :  { %3192 = vrsqrt.f32 %v126_v8  ;;  %v120_v12 = vmul.f32 0.03125, %v104_v10  ;;  %v121_v13 = vmul.f32 0.03125, %v107_v11 }
 0x134   :  { %3194 = vrsqrt.f32 %v127_v9 }
 0x135   :  { %v128_v14 = vadd.f32 1e-05, %v120_v12  ;;  %v129_v15 = vadd.f32 1e-05, %v121_v13 }
 0x136   :  { %v110_v16 = vpop.xlane.xlu1 %109  ;;  %v113_v17 = vpop.xlane.xlu0 %112 }
 0x137   :  { %3196 = vrsqrt.f32 %v128_v14  ;;  %v122_v18 = vmul.f32 0.03125, %v110_v16  ;;  %v123_v22 = vmul.f32 0.03125, %v113_v17 }
 0x138   :  { %3198 = vrsqrt.f32 %v129_v15 }
 0x139   :  { %v130_v19 = vadd.f32 1e-05, %v122_v18  ;;  %v131_v26 = vadd.f32 1e-05, %v123_v22 }
 0x13a   :  { %v116_v23 = vpop.xlane.xlu1 %115 }
 0x13b   :  { %3200 = vrsqrt.f32 %v130_v19  ;;  %v124_v27 = vmul.f32 0.03125, %v116_v23 }
 0x13c   :  { %v3191_v24 = vpop.eup %3190  ;;  %3202 = vrsqrt.f32 %v131_v26 }
 0x13d   :  { %v141_v30 = vmul.f32 %v3191_v24, %v3457_v20  ;;  %v132_v35 = vadd.f32 1e-05, %v124_v27 }
 0x13f   :  { %v156_v32 = vmul.f32 %v2567_v25, %v141_v30  ;;  %3204 = vrsqrt.f32 %v132_v35 }
 0x140   :  { %v3193_v33 = vpop.eup %3192 }
 0x141   :  { %v3195_v34 = vpop.eup %3194  ;;  %v171_v36 = vadd.f32 %v2568_v31, %v156_v32  ;;  %v142_v37 = vmul.f32 %v3193_v33, %v3465_v28 }
 0x142   :  { %v143_v40 = vmul.f32 %v3195_v34, %v3459_v21 }
 0x143   :  { %2569 = vmatmul.mubr.msk.f32.vlgmr.msra.gmra.mxu0 %vm43_vm0, %v171_v36  ;;  %v157_v41 = vmul.f32 %v2567_v25, %v142_v37 }
 0x144   :  { %v3197_v42 = vpop.eup %3196  ;;  %281 = vmatprep.mubr.f32.mxu0 %v3381_v0  ;;  %v158_v43 = vmul.f32 %v2567_v25, %v143_v40 }
 0x145   :  { %v172_v20 = vadd.f32 %v2568_v31, %v157_v41  ;;  %v144_v44 = vmul.f32 %v3197_v42, %v3467_v29  ;;  %v3199_v45 = vpop.eup %3198 }
 0x146   :  { %v173_v46 = vadd.f32 %v2568_v31, %v158_v43  ;;  %v145_v21 = vmul.f32 %v3199_v45, %v3475_v38 }
 0x147   :  { %2570 = vmatmul.mubr.msk.f32.gmra.mxu0 %vm43_vm0, %v172_v20  ;;  %v159_v28 = vmul.f32 %v2567_v25, %v144_v44  ;;  %v324_v44 = vlaneseq }
 0x148   :  { %287 = vmatprep.mubr.f32.mxu0 %v3381_v0  ;;  %v3201_v47 = vpop.eup %3200  ;;  %v160_v51 = vmul.f32 %v2567_v25, %v145_v21 }
 0x149   :  { %v174_v50 = vadd.f32 %v2568_v31, %v159_v28  ;;  %v146_v52 = vmul.f32 %v3201_v47, %v3477_v39  ;;  %v3203_v53 = vpop.eup %3202  ;;  %v325_v45 = vshrl.u32 %v324_v44, 7  ;;  %v334_v28 = vand.u32 127, %v324_v44 }
 0x14a   :  { %v175_v29 = vadd.f32 %v2568_v31, %v160_v51  ;;  %v147_v55 = vmul.f32 %v3203_v53, %v3485_v48 }
 0x14b   :  { %2571 = vmatmul.mubr.msk.f32.gmra.mxu0 %vm43_vm0, %v173_v46  ;;  %v161_v54 = vmul.f32 %v2567_v25, %v146_v52  ;;  %v326_v46 = vadd.s32 8, %v325_v45  ;;  %v328_v21 = vadd.s32 24, %v325_v45  ;;  %v335_v51 = vshra.s32 %v325_v45, 3 }
 0x14c   :  { %293 = vmatprep.mubr.f32.mxu0 %v3381_v0  ;;  %v3205_v56 = vpop.eup %3204  ;;  %v162_v57 = vmul.f32 %v2567_v25, %v147_v55  ;;  %v327_v53 = vadd.s32 16, %v325_v45 }
 0x14d   :  { %v176_v38 = vadd.f32 %v2568_v31, %v161_v54  ;;  %v148_v58 = vmul.f32 %v3205_v56, %v3487_v49  ;;  %v336_v47 = vshra.s32 %v326_v46, 3  ;;  %v338_v52 = vshra.s32 %v328_v21, 3 }
 0x14e   :  { %v177_v39 = vadd.f32 %v2568_v31, %v162_v57  ;;  %v330_v54 = vadd.s32 40, %v325_v45 }
 0x14f   :  { %2572 = vmatmul.mubr.msk.f32.gmra.mxu0 %vm43_vm0, %v174_v50  ;;  %v163_v59 = vmul.f32 %v2567_v25, %v148_v58  ;;  %v343_v50 = vshra.s32 %v334_v28, 3  ;;  %v337_v58 = vshra.s32 %v327_v53, 3 }
 0x150   :  { %299 = vmatprep.mubr.f32.mxu0 %v3381_v0 }
 0x151   :  { %v178_v48 = vadd.f32 %v2568_v31, %v163_v59  ;;  %vm3684_vm2 = vcmp.eq.s32.totalorder %v336_v47, %v343_v50  ;;  %vm3688_vm4 = vcmp.eq.s32.totalorder %v335_v51, %v343_v50  ;;  %vm3696_vm5 = vcmp.eq.s32.totalorder %v338_v52, %v343_v50 }
 0x152   :  { %vm3712_vm6 = vcmp.eq.s32.totalorder %v337_v58, %v343_v50 }
 0x153   :  { %2573 = vmatmul.mubr.msk.f32.gmra.mxu0 %vm43_vm0, %v175_v29 }
 0x154   :  { %305 = vmatprep.mubr.f32.mxu0 %v3381_v0 }
 0x157   :  { %2574 = vmatmul.mubr.msk.f32.gmra.mxu0 %vm43_vm0, %v176_v38 }
 0x158   :  { %311 = vmatprep.mubr.f32.mxu0 %v3381_v0 }
 0x15b   :  { %2575 = vmatmul.mubr.msk.f32.gmra.mxu0 %vm43_vm0, %v177_v39 }
 0x15c   :  { %317 = vmatprep.mubr.f32.mxu0 %v3381_v0 }
 0x15f   :  { %2576 = vmatmul.mubr.msk.f32.gmra.mxu0 %vm43_vm0, %v178_v48  ;;  %v340_v48 = vshra.s32 %v330_v54, 3 }
 0x161   :  { %vm3716_vm7 = vcmp.eq.s32.totalorder %v340_v48, %v343_v50 }
 0x203   :  { %v3527_v60 = vpop.f32.mrf.mxu0 }
 0x204   :  { %2889 = vmatprep.mubr.msk.f32.mxu1 %vm376_vm1, %v3527_v60 }
 0x205   :  { %v3531_v49 = vpop.f32.mrf.mxu0 }
 0x207   :  { %v3533_v61 = vpop.f32.mrf.mxu0 }
 0x209   :  { %v3535_v62 = vpop.f32.mrf.mxu0 }
 0x20b   :  { %v3537_v63 = vpop.f32.mrf.mxu0 }
 0x20d   :  { %v3539_v1 = vpop.f32.mrf.mxu0 }
 0x20f   :  { %v3541_v0 = vpop.f32.mrf.mxu0 }
 0x211   :  { %v3543_v2 = vpop.f32.mrf.mxu0 }
 0x213   :  { %v3545_v3 = vpop.f32.mrf.mxu0 }
 0x215   :  { %v3547_v4 = vpop.f32.mrf.mxu0 }
 0x217   :  { %v3549_v5 = vpop.f32.mrf.mxu0 }
 0x219   :  { %v3551_v6 = vpop.f32.mrf.mxu0 }
 0x21b   :  { %v3553_v7 = vpop.f32.mrf.mxu0 }
 0x21c   :  { %372 = vrot.lane.b32.xlu1 %v3553_v7, %s3382_s1 }
 0x21d   :  { %v3556_v8 = vpop.f32.mrf.mxu0 }
 0x21f   :  { %v3558_v9 = vpop.f32.mrf.mxu0 }
 0x220   :  { %370 = vrot.lane.b32.xlu1 %v3549_v5, %s3382_s1  ;;  %374 = vrot.lane.b32.xlu0 %v3558_v9, %s3382_s1 }
 0x221   :  { %v3562_v10 = vpop.f32.mrf.mxu0 }
 0x222   :  { %2901 = vmatprep.subr.mxu0 %v3562_v10 }
 0x223   :  { %2902 = vmatpush3.msra.mxu0 %v3562_v10 }
 0x224   :  { %368 = vrot.lane.b32.xlu1 %v3545_v3, %s3382_s1  ;;  %366 = vrot.lane.b32.xlu0 %v3541_v0, %s3382_s1 }
 0x225   :  { %2903 = vmatprep.subr.mxu0 %v3556_v8 }
 0x226   :  { %2904 = vmatpush3.msra.mxu0 %v3556_v8 }
 0x227   :  { %2905 = vmatprep.subr.mxu0 %v3551_v6 }
 0x228   :  { %2906 = vmatpush3.msra.mxu0 %v3551_v6  ;;  %364 = vrot.lane.b32.xlu1 %v3537_v63, %s3382_s1 }
 0x229   :  { %362 = vrot.lane.b32.xlu0 %v3533_v61, %s3382_s1  ;;  %2907 = vmatprep.subr.mxu0 %v3547_v4 }
 0x22a   :  { %2908 = vmatpush3.msra.mxu0 %v3547_v4 }
 0x22b   :  { %2909 = vmatprep.subr.mxu0 %v3543_v2 }
 0x22c   :  { %2910 = vmatpush3.msra.mxu0 %v3543_v2  ;;  %360 = vrot.lane.b32.xlu1 %v3527_v60, %s3382_s1 }
 0x22d   :  { %772 = vrot.lane.b32.xlu0 %v3558_v9, %s3383_s2  ;;  %2911 = vmatprep.subr.mxu0 %v3539_v1 }
 0x22e   :  { %2912 = vmatpush3.msra.mxu0 %v3539_v1 }
 0x22f   :  { %2913 = vmatprep.subr.mxu0 %v3535_v62 }
 0x230   :  { %2914 = vmatpush3.msra.mxu0 %v3535_v62  ;;  %770 = vrot.lane.b32.xlu1 %v3553_v7, %s3383_s2 }
 0x231   :  { %768 = vrot.lane.b32.xlu0 %v3549_v5, %s3383_s2  ;;  %2915 = vmatprep.subr.mxu0 %v3531_v49 }
 0x232   :  { %2916 = vmatpush3.msra.mxu0 %v3531_v49 }
 0x234   :  { %766 = vrot.lane.b32.xlu1 %v3545_v3, %s3383_s2 }
 0x235   :  { %764 = vrot.lane.b32.xlu0 %v3541_v0, %s3383_s2 }
 0x238   :  { %762 = vrot.lane.b32.xlu1 %v3537_v63, %s3383_s2 }
 0x239   :  { %760 = vrot.lane.b32.xlu0 %v3533_v61, %s3383_s2 }
 0x23c   :  { %758 = vrot.lane.b32.xlu1 %v3527_v60, %s3383_s2 }
 0x23d   :  { %742 = vrot.lane.b32.xlu0 %v3527_v60, %s3384_s18 }
 0x240   :  { %744 = vrot.lane.b32.xlu1 %v3533_v61, %s3384_s18 }
 0x241   :  { %746 = vrot.lane.b32.xlu0 %v3537_v63, %s3384_s18 }
 0x244   :  { %748 = vrot.lane.b32.xlu1 %v3541_v0, %s3384_s18 }
 0x245   :  { %750 = vrot.lane.b32.xlu0 %v3545_v3, %s3384_s18 }
 0x248   :  { %752 = vrot.lane.b32.xlu1 %v3549_v5, %s3384_s18 }
 0x249   :  { %754 = vrot.lane.b32.xlu0 %v3553_v7, %s3384_s18 }
 0x24c   :  { %756 = vrot.lane.b32.xlu1 %v3558_v9, %s3384_s18 }
 0x24d   :  { %1009 = vrot.lane.b32.xlu0 %v3551_v6, %s3384_s18 }
 0x250   :  { %1011 = vrot.lane.b32.xlu1 %v3556_v8, %s3384_s18 }
 0x251   :  { %1005 = vrot.lane.b32.xlu0 %v3543_v2, %s3384_s18 }
 0x254   :  { %1007 = vrot.lane.b32.xlu1 %v3547_v4, %s3384_s18 }
 0x255   :  { %1003 = vrot.lane.b32.xlu0 %v3539_v1, %s3384_s18 }
 0x259   :  { %1013 = vrot.lane.b32.xlu0 %v3562_v10, %s3384_s18 }
 0x28e   :  { %v373_v11 = vpop.permute.xlu1 %372 }
 0x292   :  { %v375_v12 = vpop.permute.xlu0 %374  ;;  %v371_v13 = vpop.permute.xlu1 %370 }
 0x293   :  { %2873 = vmatprep.subr.msk.mxu1 %vm376_vm1, %v375_v12 }
 0x294   :  { %2874 = vmatpush3.xpose.msk.msra.mxu1 %vm376_vm1, %v375_v12  ;;  %v332_v12 = vadd.s32 56, %v325_v45 }
 0x295   :  { %2875 = vmatprep.subr.msk.mxu1 %vm376_vm1, %v373_v11 }
 0x296   :  { %v367_v14 = vpop.permute.xlu0 %366  ;;  %v369_v16 = vpop.permute.xlu1 %368 }
 0x298   :  { %2876 = vmatpush3.xpose.msk.msra.mxu1 %vm376_vm1, %v373_v11  ;;  %v329_v11 = vadd.s32 32, %v325_v45 }
 0x299   :  { %2877 = vmatprep.subr.msk.mxu1 %vm376_vm1, %v371_v13 }
 0x29a   :  { %v365_v19 = vpop.permute.xlu1 %364 }
 0x29b   :  { %v363_v15 = vpop.permute.xlu0 %362 }
 0x29c   :  { %2878 = vmatpush3.xpose.msk.msra.mxu1 %vm376_vm1, %v371_v13 }
 0x29d   :  { %2879 = vmatprep.subr.msk.mxu1 %vm376_vm1, %v369_v16 }
 0x29e   :  { %v361_v24 = vpop.permute.xlu1 %360 }
 0x29f   :  { %v773_v17 = vpop.permute.xlu0 %772 }
 0x2a0   :  { %2880 = vmatpush3.xpose.msk.msra.mxu1 %vm376_vm1, %v369_v16 }
 0x2a1   :  { %2881 = vmatprep.subr.msk.mxu1 %vm376_vm1, %v367_v14 }
 0x2a2   :  { %v771_v27 = vpop.permute.xlu1 %770 }
 0x2a3   :  { %v769_v18 = vpop.permute.xlu0 %768 }
 0x2a4   :  { %2882 = vmatpush3.xpose.msk.msra.mxu1 %vm376_vm1, %v367_v14 }
 0x2a5   :  { %2883 = vmatprep.subr.msk.mxu1 %vm376_vm1, %v365_v19 }
 0x2a6   :  { %v767_v31 = vpop.permute.xlu1 %766 }
 0x2a7   :  { %v765_v22 = vpop.permute.xlu0 %764 }
 0x2a8   :  { %2884 = vmatpush3.xpose.msk.msra.mxu1 %vm376_vm1, %v365_v19 }
 0x2a9   :  { %2885 = vmatprep.subr.msk.mxu1 %vm376_vm1, %v363_v15 }
 0x2aa   :  { %v763_v34 = vpop.permute.xlu1 %762 }
 0x2ab   :  { %v761_v23 = vpop.permute.xlu0 %760 }
 0x2ac   :  { %2886 = vmatpush3.xpose.msk.msra.mxu1 %vm376_vm1, %v363_v15 }
 0x2ad   :  { %2887 = vmatprep.subr.msk.mxu1 %vm376_vm1, %v361_v24 }
 0x2ae   :  { %v759_v36 = vpop.permute.xlu1 %758 }
 0x2af   :  { %v743_v25 = vpop.permute.xlu0 %742 }
 0x2b0   :  { %2888 = vmatpush3.xpose.msk.msra.mxu1 %vm376_vm1, %v361_v24  ;;  %v331_v24 = vadd.s32 48, %v325_v45 }
 0x2b1   :  { %2929 = vmatprep.subr.msk.mxu1 %vm376_vm1, %v773_v17 }
 0x2b2   :  { %v745_v41 = vpop.permute.xlu1 %744 }
 0x2b3   :  { %v747_v26 = vpop.permute.xlu0 %746  ;;  %2890 = vmatmul.mubr.msk.f32.vlgmr.msra.gmra.mxu1 %vm376_vm1, %v3533_v61 }
 0x2b4   :  { %2892 = vmatprep.mubr.msk.f32.mxu1 %vm376_vm1, %v3537_v63  ;;  %2930 = vmatpush3.xpose.msk.msra.mxu1 %vm376_vm1, %v773_v17 }
 0x2b5   :  { %2931 = vmatprep.subr.msk.mxu1 %vm376_vm1, %v771_v27 }
 0x2b6   :  { %v749_v42 = vpop.permute.xlu1 %748 }
 0x2b7   :  { %v751_v30 = vpop.permute.xlu0 %750  ;;  %2893 = vmatmul.mubr.msk.f32.gmra.mxu1 %vm376_vm1, %v3541_v0 }
 0x2b8   :  { %2895 = vmatprep.mubr.msk.f32.mxu1 %vm376_vm1, %v3545_v3  ;;  %2932 = vmatpush3.xpose.msk.msra.mxu1 %vm376_vm1, %v771_v27 }
 0x2b9   :  { %2933 = vmatprep.subr.msk.mxu1 %vm376_vm1, %v769_v18 }
 0x2ba   :  { %v753_v20 = vpop.permute.xlu1 %752 }
 0x2bb   :  { %v755_v32 = vpop.permute.xlu0 %754  ;;  %2896 = vmatmul.mubr.msk.f32.gmra.mxu1 %vm376_vm1, %v3549_v5 }
 0x2bc   :  { %2898 = vmatprep.mubr.msk.f32.mxu1 %vm376_vm1, %v3553_v7  ;;  %2934 = vmatpush3.xpose.msk.msra.mxu1 %vm376_vm1, %v769_v18 }
 0x2bd   :  { %2935 = vmatprep.subr.msk.mxu1 %vm376_vm1, %v767_v31 }
 0x2be   :  { %v757_v43 = vpop.permute.xlu1 %756 }
 0x2bf   :  { %v3656_v33 = vpop.permute.xlu0 %1009  ;;  %2899 = vmatmul.mubr.msk.f32.gmra.mxu1 %vm376_vm1, %v3558_v9 }
 0x2c0   :  { %2936 = vmatpush3.xpose.msk.msra.mxu1 %vm376_vm1, %v767_v31  ;;  %2945 = vmatprep.mubr.msk.f32.mxu1 %vm376_vm1, %v743_v25 }
 0x2c1   :  { %2937 = vmatprep.subr.msk.mxu1 %vm376_vm1, %v765_v22 }
 0x2c3   :  { %v3663_v35 = vpop.permute.xlu0 %1005 }
 0x2c4   :  { %2938 = vmatpush3.xpose.msk.msra.mxu1 %vm376_vm1, %v765_v22  ;;  %v339_v22 = vshra.s32 %v329_v11, 3 }
 0x2c5   :  { %2939 = vmatprep.subr.msk.mxu1 %vm376_vm1, %v763_v34 }
 0x2c6   :  { %vm3730_vm8 = vcmp.eq.s32.totalorder %v339_v22, %v343_v50 }
 0x2c7   :  { %v3667_v37 = vpop.permute.xlu0 %1003 }
 0x2c8   :  { %2940 = vmatpush3.xpose.msk.msra.mxu1 %vm376_vm1, %v763_v34 }
 0x2c9   :  { %2941 = vmatprep.subr.msk.mxu1 %vm376_vm1, %v761_v23 }
 0x2cb   :  { %v3671_v40 = vpop.permute.xlu0 %1013 }
 0x2cc   :  { %2957 = vmatprep.subr.mxu0 %v3671_v40  ;;  %2942 = vmatpush3.xpose.msk.msra.mxu1 %vm376_vm1, %v761_v23  ;;  %v342_v23 = vshra.s32 %v332_v12, 3 }
 0x2cd   :  { %2943 = vmatprep.subr.msk.mxu1 %vm376_vm1, %v759_v36 }
 0x2ce   :  { %vm3736_vm9 = vcmp.eq.s32.totalorder %v342_v23, %v343_v50 }
 0x2d0   :  { %2944 = vmatpush3.xpose.msk.msra.mxu1 %vm376_vm1, %v759_v36 }
 0x2d3   :  { %2946 = vmatmul.mubr.msk.f32.vlgmr.msra.gmra.mxu1 %vm376_vm1, %v745_v41  ;;  %v341_v41 = vshra.s32 %v331_v24, 3 }
 0x2d4   :  { %2948 = vmatprep.mubr.msk.f32.mxu1 %vm376_vm1, %v747_v26 }
 0x2d5   :  { %vm3750_vm10 = vcmp.eq.s32.totalorder %v341_v41, %v343_v50 }
 0x2d7   :  { %2949 = vmatmul.mubr.msk.f32.gmra.mxu1 %vm376_vm1, %v749_v42 }
 0x2d8   :  { %2951 = vmatprep.mubr.msk.f32.mxu1 %vm376_vm1, %v751_v30 }
 0x2db   :  { %2952 = vmatmul.mubr.msk.f32.gmra.mxu1 %vm376_vm1, %v753_v20 }
 0x2dc   :  { %2954 = vmatprep.mubr.msk.f32.mxu1 %vm376_vm1, %v755_v32 }
 0x2df   :  { %2955 = vmatmul.mubr.msk.f32.gmra.mxu1 %vm376_vm1, %v757_v43 }
 0x373   :  { %v2891_v55 = vpop.f32.mrf.mxu1 }
 0x374   :  { %v3694_v38 = vsel %vm3684_vm2, %v2891_v55, -1e+30 }
 0x375   :  { %v475_v39 = vpop.f32.mrf.mxu1  ;;  %v526_v59 = vsel %vm522_vm3, %v3694_v38, -inf }
 0x376   :  { %v3704_v13 = vsel %vm3688_vm4, %v475_v39, -1e+30  ;;  %527 = vmax.xlane.f32.xlu1 %v526_v59 }
 0x377   :  { %v2894_v14 = vpop.f32.mrf.mxu1  ;;  %v523_v15 = vsel %vm522_vm3, %v3704_v13, -inf }
 0x378   :  { %v3710_v16 = vsel %vm3696_vm5, %v2894_v14, -1e+30  ;;  %524 = vmax.xlane.f32.xlu0 %v523_v15 }
 0x379   :  { %v485_v18 = vpop.f32.mrf.mxu1  ;;  %v532_v26 = vsel %vm522_vm3, %v3710_v16, -inf }
 0x37a   :  { %v3724_v27 = vsel %vm3712_vm6, %v485_v18, -1e+30 }
 0x37b   :  { %v2897_v25 = vpop.f32.mrf.mxu1  ;;  %v529_v20 = vsel %vm522_vm3, %v3724_v27, -inf }
 0x37c   :  { %v3728_v30 = vsel %vm3716_vm7, %v2897_v25, -1e+30  ;;  %533 = vmax.xlane.f32.xlu0 %v532_v26 }
 0x37d   :  { %v495_v32 = vpop.f32.mrf.mxu1  ;;  %v538_v34 = vsel %vm522_vm3, %v3728_v30, -inf }
 0x37e   :  { %539 = vmax.xlane.f32.xlu1 %v538_v34  ;;  %v3744_v43 = vsel %vm3730_vm8, %v495_v32, -1e+30 }
 0x37f   :  { %v2900_v42 = vpop.f32.mrf.mxu1  ;;  %v535_v21 = vsel %vm522_vm3, %v3744_v43, -inf }
 0x380   :  { %v3748_v44 = vsel %vm3736_vm9, %v2900_v42, -1e+30  ;;  %530 = vmax.xlane.f32.xlu0 %v529_v20 }
 0x381   :  { %v505_v46 = vpop.f32.mrf.mxu1  ;;  %v544_v28 = vsel %vm522_vm3, %v3748_v44, -inf }
 0x382   :  { %545 = vmax.xlane.f32.xlu1 %v544_v28  ;;  %v3760_v47 = vsel %vm3750_vm10, %v505_v46, -1e+30  ;;  %v1012_v46 = vpop.permute.xlu1 %1011 }
 0x383   :  { %v541_v51 = vsel %vm522_vm3, %v3760_v47, -inf }
 0x384   :  { %536 = vmax.xlane.f32.xlu0 %v535_v21 }
 0x386   :  { %v1008_v28 = vpop.permute.xlu1 %1007 }
 0x388   :  { %542 = vmax.xlane.f32.xlu0 %v541_v51 }
 0x393   :  { %v2947_v50 = vpop.f32.mrf.mxu1 }
 0x394   :  { %v3766_v52 = vsel %vm3684_vm2, %v2947_v50, -1e+30 }
 0x395   :  { %v872_v53 = vpop.f32.mrf.mxu1  ;;  %v922_v54 = vsel %vm522_vm3, %v3766_v52, -inf }
 0x396   :  { %v3772_v55 = vsel %vm3688_vm4, %v872_v53, -1e+30  ;;  %923 = vmax.xlane.f32.xlu1 %v922_v54 }
 0x397   :  { %v2950_v58 = vpop.f32.mrf.mxu1  ;;  %v919_v39 = vsel %vm522_vm3, %v3772_v55, -inf }
 0x398   :  { %v3778_v59 = vsel %vm3696_vm5, %v2950_v58, -1e+30  ;;  %920 = vmax.xlane.f32.xlu0 %v919_v39 }
 0x399   :  { %v882_v48 = vpop.f32.mrf.mxu1  ;;  %v928_v15 = vsel %vm522_vm3, %v3778_v59, -inf }
 0x39a   :  { %v3782_v11 = vsel %vm3712_vm6, %v882_v48, -1e+30 }
 0x39b   :  { %v2953_v12 = vpop.f32.mrf.mxu1  ;;  %v925_v14 = vsel %vm522_vm3, %v3782_v11, -inf }
 0x39c   :  { %v3790_v18 = vsel %vm3716_vm7, %v2953_v12, -1e+30  ;;  %926 = vmax.xlane.f32.xlu1 %v925_v14  ;;  %929 = vmax.xlane.f32.xlu0 %v928_v15 }
 0x39d   :  { %v892_v22 = vpop.f32.mrf.mxu1  ;;  %v934_v25 = vsel %vm522_vm3, %v3790_v18, -inf }
 0x39e   :  { %v3794_v23 = vsel %vm3730_vm8, %v892_v22, -1e+30 }
 0x39f   :  { %v2956_v24 = vpop.f32.mrf.mxu1  ;;  %v931_v26 = vsel %vm522_vm3, %v3794_v23, -inf }
 0x3a0   :  { %v3802_v32 = vsel %vm3736_vm9, %v2956_v24, -1e+30  ;;  %935 = vmax.xlane.f32.xlu1 %v934_v25  ;;  %932 = vmax.xlane.f32.xlu0 %v931_v26 }
 0x3a1   :  { %v902_v34 = vpop.f32.mrf.mxu1  ;;  %v940_v41 = vsel %vm522_vm3, %v3802_v32, -inf }
 0x3a2   :  { %v3808_v42 = vsel %vm3750_vm10, %v902_v34, -1e+30 }
 0x3a3   :  { %v937_v20 = vsel %vm522_vm3, %v3808_v42, -inf }
 0x3a4   :  { %941 = vmax.xlane.f32.xlu0 %v940_v41 }
 0x3a8   :  { %938 = vmax.xlane.f32.xlu0 %v937_v20 }
 0x3b1   :  { %1001 = vrot.lane.b32.xlu1 %v3535_v62, %s3384_s18 }
 0x3b5   :  { %1456 = vrot.lane.b32.xlu1 %v3553_v7, %s3385_s19 }
 0x3b9   :  { %1454 = vrot.lane.b32.xlu1 %v3549_v5, %s3385_s19 }
 0x3bd   :  { %1452 = vrot.lane.b32.xlu1 %v3545_v3, %s3385_s19 }
 0x3be   :  { %999 = vrot.lane.b32.xlu0 %v3531_v49, %s3384_s18 }
 0x3c1   :  { %1448 = vrot.lane.b32.xlu1 %v3537_v63, %s3385_s19 }
 0x3c2   :  { %1458 = vrot.lane.b32.xlu0 %v3558_v9, %s3385_s19 }
 0x3ff   :  { %v528_v21 = vpop.xlane.xlu1 %527 }
 0x400   :  { %v548_v51 = vsub.f32 %v3694_v38, %v528_v21 }
 0x401   :  { %v525_v50 = vpop.xlane.xlu0 %524 }
 0x402   :  { %v547_v53 = vsub.f32 %v3704_v13, %v525_v50  ;;  %v557_v54 = vmul.f32 1.442695, %v548_v51 }
 0x404   :  { %v555_v58 = vmul.f32 1.442695, %v547_v53 }
 0x405   :  { %v534_v39 = vpop.xlane.xlu0 %533 }
 0x406   :  { %3206 = vpow2.f32 %v555_v58  ;;  %v550_v48 = vsub.f32 %v3710_v16, %v534_v39 }
 0x407   :  { %3208 = vpow2.f32 %v557_v54  ;;  %v540_v12 = vpop.xlane.xlu1 %539 }
 0x408   :  { %v561_v22 = vmul.f32 1.442695, %v550_v48  ;;  %v552_v24 = vsub.f32 %v3728_v30, %v540_v12 }
 0x409   :  { %v531_v14 = vpop.xlane.xlu0 %530 }
 0x40a   :  { %v549_v15 = vsub.f32 %v3724_v27, %v531_v14  ;;  %v565_v34 = vmul.f32 1.442695, %v552_v24 }
 0x40b   :  { %v546_v26 = vpop.xlane.xlu1 %545 }
 0x40c   :  { %v559_v25 = vmul.f32 1.442695, %v549_v15  ;;  %v554_v41 = vsub.f32 %v3748_v44, %v546_v26 }
 0x40d   :  { %v537_v38 = vpop.xlane.xlu0 %536 }
 0x40e   :  { %3210 = vpow2.f32 %v559_v25  ;;  %v551_v13 = vsub.f32 %v3744_v43, %v537_v38  ;;  %v569_v27 = vmul.f32 1.442695, %v554_v41 }
 0x40f   :  { %3212 = vpow2.f32 %v561_v22 }
 0x410   :  { %v563_v20 = vmul.f32 1.442695, %v551_v13 }
 0x411   :  { %v543_v21 = vpop.xlane.xlu0 %542 }
 0x412   :  { %3214 = vpow2.f32 %v563_v20  ;;  %v553_v16 = vsub.f32 %v3760_v47, %v543_v21 }
 0x413   :  { %v3834_v51 = vpop.eup %3206  ;;  %3216 = vpow2.f32 %v565_v34 }
 0x414   :  { %v3836_v30 = vpop.eup %3208  ;;  %v567_v50 = vmul.f32 1.442695, %v553_v16  ;;  %2917 = vmatprep.mubr.msk.f32.mxu0 %vm522_vm3, %v3834_v51 }
 0x415   :  { %2918 = vmatmul.mubr.msk.f32.vlgmr.msra.gmra.mxu0 %vm522_vm3, %v3836_v30 }
 0x416   :  { %3218 = vpow2.f32 %v567_v50  ;;  %2958 = vmatpush3.msra.mxu0 %v3671_v40 }
 0x417   :  { %3220 = vpow2.f32 %v569_v27  ;;  %2959 = vmatprep.subr.mxu0 %v1012_v46 }
 0x418   :  { %2960 = vmatpush3.msra.mxu0 %v1012_v46 }
 0x419   :  { %2961 = vmatprep.subr.mxu0 %v3656_v33 }
 0x41a   :  { %2962 = vmatpush3.msra.mxu0 %v3656_v33 }
 0x41b   :  { %v3845_v43 = vpop.eup %3210  ;;  %2963 = vmatprep.subr.mxu0 %v1008_v28 }
 0x41c   :  { %v3847_v44 = vpop.eup %3212  ;;  %2964 = vmatpush3.msra.mxu0 %v1008_v28  ;;  %2920 = vmatprep.mubr.msk.f32.mxu0 %vm522_vm3, %v3845_v43 }
 0x41d   :  { %2965 = vmatprep.subr.mxu0 %v3663_v35  ;;  %2921 = vmatmul.mubr.msk.f32.gmra.mxu0 %vm522_vm3, %v3847_v44 }
 0x41e   :  { %2966 = vmatpush3.msra.mxu0 %v3663_v35 }
 0x41f   :  { %v3855_v40 = vpop.eup %3214  ;;  %2967 = vmatprep.subr.mxu0 %v3667_v37  ;;  %v924_v33 = vpop.xlane.xlu1 %923 }
 0x420   :  { %v3858_v47 = vpop.eup %3216  ;;  %v944_v46 = vsub.f32 %v3766_v52, %v924_v33  ;;  %2968 = vmatpush3.msra.mxu0 %v3667_v37  ;;  %2923 = vmatprep.mubr.msk.f32.mxu0 %vm522_vm3, %v3855_v40 }
 0x421   :  { %v921_v28 = vpop.xlane.xlu0 %920  ;;  %2924 = vmatmul.mubr.msk.f32.gmra.mxu0 %vm522_vm3, %v3858_v47 }
 0x422   :  { %v953_v53 = vmul.f32 1.442695, %v944_v46  ;;  %v943_v35 = vsub.f32 %v3772_v55, %v921_v28 }
 0x423   :  { %v3867_v54 = vpop.eup %3218 }
 0x424   :  { %v3869_v58 = vpop.eup %3220  ;;  %3222 = vpow2.f32 %v953_v53  ;;  %v951_v39 = vmul.f32 1.442695, %v943_v35  ;;  %2926 = vmatprep.mubr.msk.f32.mxu0 %vm522_vm3, %v3867_v54 }
 0x425   :  { %v927_v37 = vpop.xlane.xlu1 %926  ;;  %v930_v52 = vpop.xlane.xlu0 %929  ;;  %2927 = vmatmul.mubr.msk.f32.gmra.mxu0 %vm522_vm3, %v3869_v58 }
 0x426   :  { %3224 = vpow2.f32 %v951_v39  ;;  %v945_v48 = vsub.f32 %v3782_v11, %v927_v37  ;;  %v946_v12 = vsub.f32 %v3778_v59, %v930_v52 }
 0x428   :  { %v955_v55 = vmul.f32 1.442695, %v945_v48  ;;  %v957_v14 = vmul.f32 1.442695, %v946_v12 }
 0x429   :  { %v936_v15 = vpop.xlane.xlu1 %935  ;;  %v933_v22 = vpop.xlane.xlu0 %932 }
 0x42a   :  { %3226 = vpow2.f32 %v955_v55  ;;  %v948_v24 = vsub.f32 %v3790_v18, %v936_v15  ;;  %v947_v25 = vsub.f32 %v3794_v23, %v933_v22 }
 0x42b   :  { %3228 = vpow2.f32 %v957_v14 }
 0x42c   :  { %v959_v26 = vmul.f32 1.442695, %v947_v25  ;;  %v961_v38 = vmul.f32 1.442695, %v948_v24 }
 0x42d   :  { %v1002_v13 = vpop.permute.xlu1 %1001  ;;  %v942_v34 = vpop.xlane.xlu0 %941 }
 0x42e   :  { %2969 = vmatprep.subr.mxu0 %v1002_v13  ;;  %3230 = vpow2.f32 %v959_v26  ;;  %v950_v11 = vsub.f32 %v3802_v32, %v942_v34  ;;  %v1169_v32 = vld [vmem:[%s4430_s4 + $0x18] sm:$0xff] }
 0x42f   :  { %2970 = vmatpush3.msra.mxu0 %v1002_v13  ;;  %3232 = vpow2.f32 %v961_v38 }
 0x430   :  { %v965_v16 = vmul.f32 1.442695, %v950_v11 }
 0x431   :  { %v3223_v59 = vpop.eup %3222  ;;  %v939_v41 = vpop.xlane.xlu0 %938 }
 0x432   :  { %v949_v20 = vsub.f32 %v3808_v42, %v939_v41  ;;  %v970_v21 = vsel %vm522_vm3, %v3223_v59, 0.0  ;;  %v1168_v42 = vld [vmem:[%s4430_s4 + $0x10] sm:$0xff] }
 0x433   :  { %v3225_v18 = vpop.eup %3224  ;;  %971 = vadd.xlane.f32.xlu0 %v970_v21 }
 0x434   :  { %v963_v23 = vmul.f32 1.442695, %v949_v20  ;;  %2973 = vmatprep.mubr.msk.f32.mxu0 %vm522_vm3, %v3225_v18  ;;  %v967_v27 = vsel %vm522_vm3, %v3225_v18, 0.0 }
 0x435   :  { %968 = vadd.xlane.f32.xlu1 %v967_v27  ;;  %v1000_v50 = vpop.permute.xlu0 %999 }
 0x436   :  { %3234 = vpow2.f32 %v963_v23  ;;  %2971 = vmatprep.subr.mxu0 %v1000_v50 }
 0x437   :  { %v3227_v33 = vpop.eup %3226  ;;  %3236 = vpow2.f32 %v965_v16  ;;  %2972 = vmatpush3.msra.mxu0 %v1000_v50 }
 0x438   :  { %v3229_v46 = vpop.eup %3228  ;;  %2974 = vmatmul.mubr.msk.f32.vlgmr.msra.gmra.mxu0 %vm522_vm3, %v3223_v59  ;;  %2985 = vmatprep.subr.mxu0 %v1169_v32  ;;  %v973_v39 = vsel %vm522_vm3, %v3227_v33, 0.0 }
 0x439   :  { %v976_v28 = vsel %vm522_vm3, %v3229_v46, 0.0  ;;  %2976 = vmatprep.mubr.msk.f32.mxu0 %vm522_vm3, %v3227_v33  ;;  %2986 = vmatpush3.msra.mxu0 %v1169_v32  ;;  %v3893_v53 = vpop.permute.xlu0 %1458 }
 0x43a   :  { %977 = vadd.xlane.f32.xlu1 %v976_v28  ;;  %2987 = vmatprep.subr.mxu0 %v1168_v42 }
 0x43b   :  { %2988 = vmatpush3.msra.mxu0 %v1168_v42  ;;  %v3231_v35 = vpop.eup %3230 }
 0x43c   :  { %2977 = vmatmul.mubr.msk.f32.gmra.mxu0 %vm522_vm3, %v3229_v46  ;;  %3017 = vmatprep.subr.msk.mxu0 %vm376_vm1, %v3893_v53  ;;  %v3233_v37 = vpop.eup %3232  ;;  %v979_v55 = vsel %vm522_vm3, %v3231_v35, 0.0 }
 0x43d   :  { %2979 = vmatprep.mubr.msk.f32.mxu0 %vm522_vm3, %v3231_v35  ;;  %v982_v52 = vsel %vm522_vm3, %v3233_v37, 0.0 }
 0x43e   :  { %974 = vadd.xlane.f32.xlu1 %v973_v39 }
 0x440   :  { %2980 = vmatmul.mubr.msk.f32.gmra.mxu0 %vm522_vm3, %v3233_v37 }
 0x442   :  { %983 = vadd.xlane.f32.xlu1 %v982_v52 }
 0x443   :  { %v3235_v48 = vpop.eup %3234 }
 0x444   :  { %v3237_v12 = vpop.eup %3236  ;;  %2982 = vmatprep.mubr.msk.f32.mxu0 %vm522_vm3, %v3235_v48  ;;  %v985_v15 = vsel %vm522_vm3, %v3235_v48, 0.0 }
 0x445   :  { %2983 = vmatmul.mubr.msk.f32.gmra.mxu0 %vm522_vm3, %v3237_v12  ;;  %v988_v14 = vsel %vm522_vm3, %v3237_v12, 0.0 }
 0x446   :  { %980 = vadd.xlane.f32.xlu1 %v979_v55 }
 0x449   :  { %1450 = vrot.lane.b32.xlu0 %v3541_v0, %s3385_s19 }
 0x44a   :  { %989 = vadd.xlane.f32.xlu1 %v988_v14 }
 0x45b   :  { %1444 = vrot.lane.b32.xlu1 %v3527_v60, %s3385_s19 }
 0x45f   :  { %1430 = vrot.lane.b32.xlu1 %v3533_v61, %s3386_s25 }
 0x463   :  { %1434 = vrot.lane.b32.xlu1 %v3541_v0, %s3386_s25 }
 0x467   :  { %1438 = vrot.lane.b32.xlu1 %v3549_v5, %s3386_s25 }
 0x468   :  { %986 = vadd.xlane.f32.xlu0 %v985_v15 }
 0x46b   :  { %1442 = vrot.lane.b32.xlu1 %v3558_v9, %s3386_s25 }
 0x46f   :  { %2013 = vrot.lane.b32.xlu1 %v3553_v7, %s3380_s22 }
 0x473   :  { %2009 = vrot.lane.b32.xlu1 %v3545_v3, %s3380_s22 }
 0x477   :  { %2005 = vrot.lane.b32.xlu1 %v3537_v63, %s3380_s22 }
 0x47b   :  { %2001 = vrot.lane.b32.xlu1 %v3527_v60, %s3380_s22 }
 0x47e   :  { %1446 = vrot.lane.b32.xlu0 %v3533_v61, %s3385_s19 }
 0x47f   :  { %1987 = vrot.lane.b32.xlu1 %v3533_v61, %s3387_s26 }
 0x482   :  { %1428 = vrot.lane.b32.xlu0 %v3527_v60, %s3386_s25 }
 0x483   :  { %1991 = vrot.lane.b32.xlu1 %v3541_v0, %s3387_s26 }
 0x486   :  { %1432 = vrot.lane.b32.xlu0 %v3537_v63, %s3386_s25 }
 0x487   :  { %1995 = vrot.lane.b32.xlu1 %v3549_v5, %s3387_s26 }
 0x48a   :  { %1436 = vrot.lane.b32.xlu0 %v3545_v3, %s3386_s25 }
 0x48b   :  { %1999 = vrot.lane.b32.xlu1 %v3558_v9, %s3387_s26 }
 0x48e   :  { %1440 = vrot.lane.b32.xlu0 %v3553_v7, %s3386_s25 }
 0x492   :  { %2015 = vrot.lane.b32.xlu0 %v3558_v9, %s3380_s22  ;;  %v574_v9 = vsel %vm522_vm3, %v3836_v30, 0.0  ;;  %v580_v30 = vsel %vm522_vm3, %v3847_v44, 0.0  ;;  %v741_v44 = vld [vmem:[%s4430_s4 + $0x8] sm:$0xff] }
 0x493   :  { %3001 = vmatprep.subr.mxu1 %v741_v44 }
 0x494   :  { %3002 = vmatpush3.msra.mxu1 %v741_v44 }
 0x496   :  { %2011 = vrot.lane.b32.xlu0 %v3549_v5, %s3380_s22 }
 0x49a   :  { %2007 = vrot.lane.b32.xlu0 %v3541_v0, %s3380_s22  ;;  %v586_v0 = vsel %vm522_vm3, %v3858_v47, 0.0 }
 0x49e   :  { %2003 = vrot.lane.b32.xlu0 %v3533_v61, %s3380_s22  ;;  %v3967_v61 = vpop.permute.xlu1 %1456 }
 0x4a2   :  { %1985 = vrot.lane.b32.xlu0 %v3527_v60, %s3387_s26  ;;  %v592_v60 = vsel %vm522_vm3, %v3869_v58, 0.0 }
 0x4a6   :  { %1989 = vrot.lane.b32.xlu0 %v3537_v63, %s3387_s26  ;;  %v3971_v63 = vpop.permute.xlu1 %1454 }
 0x4aa   :  { %1993 = vrot.lane.b32.xlu0 %v3545_v3, %s3387_s26  ;;  %v571_v3 = vsel %vm522_vm3, %v3834_v51, 0.0  ;;  %v3977_v5 = vpop.permute.xlu1 %1452  ;;  %v583_v51 = vsel %vm522_vm3, %v3855_v40, 0.0  ;;  %v740_v40 = vld [vmem:[%s4430_s4] sm:$0xff] }
 0x4ab   :  { %3003 = vmatprep.subr.mxu1 %v740_v40 }
 0x4ac   :  { %3004 = vmatpush3.msra.mxu1 %v740_v40 }
 0x4ae   :  { %1997 = vrot.lane.b32.xlu0 %v3553_v7, %s3387_s26  ;;  %v577_v7 = vsel %vm522_vm3, %v3845_v43, 0.0  ;;  %v3987_v47 = vpop.permute.xlu1 %1448  ;;  %v589_v43 = vsel %vm522_vm3, %v3867_v54, 0.0 }
 0x4af   :  { %575 = vadd.xlane.f32.xlu1 %v574_v9 }
 0x4b3   :  { %587 = vadd.xlane.f32.xlu1 %v586_v0 }
 0x4b7   :  { %593 = vadd.xlane.f32.xlu1 %v592_v60 }
 0x4bc   :  { %v972_v54 = vpop.xlane.xlu0 %971 }
 0x4be   :  { %v969_v58 = vpop.xlane.xlu1 %968 }
 0x4bf   :  { %3238 = vrcp.f32 %v969_v58 }
 0x4c0   :  { %v4009_v59 = vpop.permute.xlu0 %1450  ;;  %3240 = vrcp.f32 %v972_v54 }
 0x4c3   :  { %v978_v24 = vpop.xlane.xlu1 %977 }
 0x4c7   :  { %v975_v38 = vpop.xlane.xlu1 %974 }
 0x4c8   :  { %1689 = vrot.lane.b32.xlu1 %v3556_v8, %s3386_s25  ;;  %3242 = vrcp.f32 %v975_v38 }
 0x4c9   :  { %3244 = vrcp.f32 %v978_v24 }
 0x4cb   :  { %v984_v11 = vpop.xlane.xlu1 %983 }
 0x4cc   :  { %1687 = vrot.lane.b32.xlu1 %v3551_v6, %s3386_s25  ;;  %v3239_v32 = vpop.eup %3238 }
 0x4cd   :  { %572 = vadd.xlane.f32.xlu0 %v571_v3  ;;  %v3241_v46 = vpop.eup %3240 }
 0x4cf   :  { %v981_v21 = vpop.xlane.xlu1 %980 }
 0x4d0   :  { %1685 = vrot.lane.b32.xlu1 %v3547_v4, %s3386_s25  ;;  %3246 = vrcp.f32 %v981_v21 }
 0x4d1   :  { %578 = vadd.xlane.f32.xlu0 %v577_v7  ;;  %3248 = vrcp.f32 %v984_v11 }
 0x4d3   :  { %v990_v50 = vpop.xlane.xlu1 %989 }
 0x4d4   :  { %1681 = vrot.lane.b32.xlu1 %v3539_v1, %s3386_s25 }
 0x4d5   :  { %581 = vadd.xlane.f32.xlu0 %v580_v30  ;;  %v3991_v22 = vpop.f32.mrf.mxu0  ;;  %v3243_v37 = vpop.eup %3242 }
 0x4d6   :  { %v3245_v48 = vpop.eup %3244 }
 0x4d7   :  { %v3995_v25 = vpop.f32.mrf.mxu0  ;;  %v1445_v9 = vpop.permute.xlu1 %1444 }
 0x4d9   :  { %584 = vadd.xlane.f32.xlu0 %v583_v51 }
 0x4dd   :  { %590 = vadd.xlane.f32.xlu0 %v589_v43  ;;  %v3997_v26 = vpop.f32.mrf.mxu0  ;;  %v3247_v0 = vpop.eup %3246 }
 0x4de   :  { %v3249_v3 = vpop.eup %3248  ;;  %v1431_v43 = vpop.permute.xlu1 %1430 }
 0x4df   :  { %v4005_v13 = vpop.f32.mrf.mxu0 }
 0x4e1   :  { %v4007_v34 = vpop.f32.mrf.mxu0 }
 0x4e2   :  { %v1435_v54 = vpop.permute.xlu1 %1434 }
 0x4e3   :  { %v4011_v41 = vpop.f32.mrf.mxu0 }
 0x4e5   :  { %v4013_v18 = vpop.f32.mrf.mxu0 }
 0x4e6   :  { %v1439_v11 = vpop.permute.xlu1 %1438 }
 0x4e7   :  { %v4017_v23 = vpop.f32.mrf.mxu0 }
 0x4f1   :  { %v987_v20 = vpop.xlane.xlu0 %986 }
 0x4f2   :  { %3250 = vrcp.f32 %v987_v20  ;;  %v1443_v20 = vpop.permute.xlu1 %1442 }
 0x4f3   :  { %1691 = vrot.lane.b32.xlu0 %v3562_v10, %s3386_s25  ;;  %3252 = vrcp.f32 %v990_v50 }
 0x4f5   :  { %v1447_v16 = vpop.permute.xlu0 %1446 }
 0x4f6   :  { %v2014_v21 = vpop.permute.xlu1 %2013 }
 0x4f7   :  { %1683 = vrot.lane.b32.xlu0 %v3543_v2, %s3386_s25 }
 0x4f8   :  { %v2975_v27 = vpop.f32.mrf.mxu0 }
 0x4f9   :  { %v1429_v33 = vpop.permute.xlu0 %1428  ;;  %v1161_v35 = vmul.f32 %v3241_v46, %v2975_v27 }
 0x4fa   :  { %v1113_v42 = vpop.f32.mrf.mxu0 }
 0x4fb   :  { %v1160_v28 = vmul.f32 %v3239_v32, %v1113_v42 }
 0x4fc   :  { %v2978_v39 = vpop.f32.mrf.mxu0 }
 0x4fd   :  { %2989 = vmatprep.mubr.msk.f32.mxu0 %vm376_vm1, %v1160_v28  ;;  %v1163_v55 = vmul.f32 %v3245_v48, %v2978_v39  ;;  %v1433_v14 = vpop.permute.xlu0 %1432 }
 0x4fe   :  { %v1123_v52 = vpop.f32.mrf.mxu0  ;;  %2990 = vmatmul.mubr.msk.f32.vlgmr.msra.gmra.mxu0 %vm376_vm1, %v1161_v35 }
 0x4ff   :  { %v1162_v12 = vmul.f32 %v3243_v37, %v1123_v52  ;;  %3018 = vmatpush3.xpose.msk.msra.mxu0 %vm376_vm1, %v3893_v53  ;;  %v3251_v58 = vpop.eup %3250 }
 0x500   :  { %3019 = vmatprep.subr.msk.mxu0 %vm376_vm1, %v3967_v61  ;;  %v2981_v15 = vpop.f32.mrf.mxu0 }
 0x501   :  { %2992 = vmatprep.mubr.msk.f32.mxu0 %vm376_vm1, %v1162_v12  ;;  %v1165_v30 = vmul.f32 %v3249_v3, %v2981_v15  ;;  %v1437_v51 = vpop.permute.xlu0 %1436 }
 0x502   :  { %v1133_v60 = vpop.f32.mrf.mxu0  ;;  %2993 = vmatmul.mubr.msk.f32.gmra.mxu0 %vm376_vm1, %v1163_v55 }
 0x503   :  { %v1164_v7 = vmul.f32 %v3247_v0, %v1133_v60  ;;  %3020 = vmatpush3.xpose.msk.msra.mxu0 %vm376_vm1, %v3967_v61  ;;  %v3253_v61 = vpop.eup %3252 }
 0x504   :  { %3021 = vmatprep.subr.msk.mxu0 %vm376_vm1, %v3971_v63 }
 0x505   :  { %v2984_v53 = vpop.f32.mrf.mxu0  ;;  %2995 = vmatprep.mubr.msk.f32.mxu0 %vm376_vm1, %v1164_v7  ;;  %v1441_v38 = vpop.permute.xlu0 %1440 }
 0x506   :  { %2996 = vmatmul.mubr.msk.f32.gmra.mxu0 %vm376_vm1, %v1165_v30  ;;  %v1167_v40 = vmul.f32 %v3253_v61, %v2984_v53 }
 0x507   :  { %3022 = vmatpush3.xpose.msk.msra.mxu0 %vm376_vm1, %v3971_v63  ;;  %v1143_v24 = vpop.f32.mrf.mxu0 }
 0x508   :  { %v1166_v44 = vmul.f32 %v3251_v58, %v1143_v24  ;;  %3023 = vmatprep.subr.msk.mxu0 %vm376_vm1, %v3977_v5 }
 0x509   :  { %v2016_v63 = vpop.permute.xlu0 %2015 }
 0x50a   :  { %2998 = vmatprep.mubr.msk.f32.mxu0 %vm376_vm1, %v1166_v44 }
 0x50b   :  { %3024 = vmatpush3.xpose.msk.msra.mxu0 %vm376_vm1, %v3977_v5 }
 0x50c   :  { %2999 = vmatmul.mubr.msk.f32.gmra.mxu0 %vm376_vm1, %v1167_v40  ;;  %3025 = vmatprep.subr.msk.mxu0 %vm376_vm1, %v4009_v59 }
 0x50d   :  { %3033 = vmatprep.mubr.msk.f32.mxu0 %vm376_vm1, %v1429_v33  ;;  %v2012_v5 = vpop.permute.xlu0 %2011 }
 0x50f   :  { %3026 = vmatpush3.xpose.msk.msra.mxu0 %vm376_vm1, %v4009_v59 }
 0x510   :  { %3027 = vmatprep.subr.msk.mxu0 %vm376_vm1, %v3987_v47 }
 0x511   :  { %v2008_v59 = vpop.permute.xlu0 %2007 }
 0x513   :  { %3028 = vmatpush3.xpose.msk.msra.mxu0 %vm376_vm1, %v3987_v47 }
 0x514   :  { %3029 = vmatprep.subr.msk.mxu0 %vm376_vm1, %v1447_v16 }
 0x515   :  { %v2004_v47 = vpop.permute.xlu0 %2003 }
 0x517   :  { %3030 = vmatpush3.xpose.msk.msra.mxu0 %vm376_vm1, %v1447_v16  ;;  %v2010_v16 = vpop.permute.xlu1 %2009 }
 0x518   :  { %3031 = vmatprep.subr.msk.mxu0 %vm376_vm1, %v1445_v9 }
 0x519   :  { %v1986_v27 = vpop.permute.xlu0 %1985 }
 0x51b   :  { %3032 = vmatpush3.xpose.msk.msra.mxu0 %vm376_vm1, %v1445_v9  ;;  %v2006_v50 = vpop.permute.xlu1 %2005 }
 0x51c   :  { %3089 = vmatprep.subr.msk.mxu0 %vm376_vm1, %v2016_v63 }
 0x51d   :  { %v1990_v42 = vpop.permute.xlu0 %1989 }
 0x51e   :  { %3034 = vmatmul.mubr.msk.f32.vlgmr.msra.gmra.mxu0 %vm376_vm1, %v1431_v43 }
 0x51f   :  { %3036 = vmatprep.mubr.msk.f32.mxu0 %vm376_vm1, %v1433_v14  ;;  %3090 = vmatpush3.xpose.msk.msra.mxu0 %vm376_vm1, %v2016_v63  ;;  %v2002_v32 = vpop.permute.xlu1 %2001 }
 0x520   :  { %3091 = vmatprep.subr.msk.mxu0 %vm376_vm1, %v2014_v21 }
 0x521   :  { %v1994_v28 = vpop.permute.xlu0 %1993 }
 0x522   :  { %3037 = vmatmul.mubr.msk.f32.gmra.mxu0 %vm376_vm1, %v1435_v54 }
 0x523   :  { %3039 = vmatprep.mubr.msk.f32.mxu0 %vm376_vm1, %v1437_v51  ;;  %3092 = vmatpush3.xpose.msk.msra.mxu0 %vm376_vm1, %v2014_v21  ;;  %v1988_v33 = vpop.permute.xlu1 %1987 }
 0x524   :  { %3093 = vmatprep.subr.msk.mxu0 %vm376_vm1, %v2012_v5 }
 0x525   :  { %v1998_v39 = vpop.permute.xlu0 %1997 }
 0x526   :  { %3040 = vmatmul.mubr.msk.f32.gmra.mxu0 %vm376_vm1, %v1439_v11 }
 0x527   :  { %3042 = vmatprep.mubr.msk.f32.mxu0 %vm376_vm1, %v1441_v38  ;;  %3094 = vmatpush3.xpose.msk.msra.mxu0 %vm376_vm1, %v2012_v5  ;;  %v1992_v46 = vpop.permute.xlu1 %1991 }
 0x528   :  { %3095 = vmatprep.subr.msk.mxu0 %vm376_vm1, %v2010_v16 }
 0x52a   :  { %3043 = vmatmul.mubr.msk.f32.gmra.mxu0 %vm376_vm1, %v1443_v20 }
 0x52b   :  { %3096 = vmatpush3.xpose.msk.msra.mxu0 %vm376_vm1, %v2010_v16  ;;  %3105 = vmatprep.mubr.msk.f32.mxu0 %vm376_vm1, %v1986_v27  ;;  %v1996_v35 = vpop.permute.xlu1 %1995 }
 0x52c   :  { %3097 = vmatprep.subr.msk.mxu0 %vm376_vm1, %v2008_v59 }
 0x52f   :  { %3098 = vmatpush3.xpose.msk.msra.mxu0 %vm376_vm1, %v2008_v59  ;;  %v2000_v37 = vpop.permute.xlu1 %1999 }
 0x530   :  { %3099 = vmatprep.subr.msk.mxu0 %vm376_vm1, %v2006_v50 }
 0x533   :  { %3100 = vmatpush3.xpose.msk.msra.mxu0 %vm376_vm1, %v2006_v50 }
 0x534   :  { %3101 = vmatprep.subr.msk.mxu0 %vm376_vm1, %v2004_v47 }
 0x537   :  { %3102 = vmatpush3.xpose.msk.msra.mxu0 %vm376_vm1, %v2004_v47 }
 0x538   :  { %3103 = vmatprep.subr.msk.mxu0 %vm376_vm1, %v2002_v32  ;;  %v576_v52 = vpop.xlane.xlu1 %575 }
 0x539   :  { %3254 = vrcp.f32 %v576_v52 }
 0x53b   :  { %3104 = vmatpush3.xpose.msk.msra.mxu0 %vm376_vm1, %v2002_v32 }
 0x53c   :  { %v588_v12 = vpop.xlane.xlu1 %587 }
 0x53e   :  { %3106 = vmatmul.mubr.msk.f32.vlgmr.msra.gmra.mxu0 %vm376_vm1, %v1988_v33 }
 0x53f   :  { %3108 = vmatprep.mubr.msk.f32.mxu0 %vm376_vm1, %v1990_v42 }
 0x540   :  { %v594_v14 = vpop.xlane.xlu1 %593 }
 0x542   :  { %3109 = vmatmul.mubr.msk.f32.gmra.mxu0 %vm376_vm1, %v1992_v46 }
 0x543   :  { %3111 = vmatprep.mubr.msk.f32.mxu0 %vm376_vm1, %v1994_v28 }
 0x544   :  { %v1690_v60 = vpop.permute.xlu1 %1689 }
 0x546   :  { %3112 = vmatmul.mubr.msk.f32.gmra.mxu0 %vm376_vm1, %v1996_v35  ;;  %v3255_v0 = vpop.eup %3254 }
 0x547   :  { %3114 = vmatprep.mubr.msk.f32.mxu0 %vm376_vm1, %v1998_v39  ;;  %v733_v30 = vmul.f32 %v3255_v0, %v3991_v22 }
 0x548   :  { %v1688_v58 = vpop.permute.xlu1 %1687 }
 0x54a   :  { %3115 = vmatmul.mubr.msk.f32.gmra.mxu0 %vm376_vm1, %v2000_v37 }
 0x54c   :  { %v1686_v61 = vpop.permute.xlu1 %1685 }
 0x550   :  { %v1682_v11 = vpop.permute.xlu1 %1681 }
 0x556   :  { %v573_v48 = vpop.xlane.xlu0 %572 }
 0x557   :  { %3256 = vrcp.f32 %v573_v48 }
 0x55a   :  { %v579_v55 = vpop.xlane.xlu0 %578 }
 0x55b   :  { %3258 = vrcp.f32 %v579_v55 }
 0x55e   :  { %v582_v15 = vpop.xlane.xlu0 %581 }
 0x55f   :  { %3260 = vrcp.f32 %v582_v15 }
 0x560   :  { %3262 = vrcp.f32 %v588_v12 }
 0x562   :  { %v585_v9 = vpop.xlane.xlu0 %584 }
 0x563   :  { %3264 = vrcp.f32 %v585_v9 }
 0x564   :  { %v3257_v3 = vpop.eup %3256  ;;  %3266 = vrcp.f32 %v594_v14 }
 0x565   :  { %v732_v7 = vmul.f32 %v3257_v3, %v3995_v25 }
 0x566   :  { %v591_v53 = vpop.xlane.xlu0 %590 }
 0x567   :  { %3268 = vrcp.f32 %v591_v53  ;;  %3005 = vmatprep.mubr.msk.f32.mxu1 %vm376_vm1, %v732_v7 }
 0x568   :  { %v3259_v51 = vpop.eup %3258  ;;  %3006 = vmatmul.mubr.msk.f32.vlgmr.msra.gmra.mxu1 %vm376_vm1, %v733_v30 }
 0x569   :  { %v734_v43 = vmul.f32 %v3259_v51, %v4005_v13 }
 0x56a   :  { %v1692_v24 = vpop.permute.xlu0 %1691 }
 0x56b   :  { %3008 = vmatprep.mubr.msk.f32.mxu1 %vm376_vm1, %v734_v43  ;;  %3045 = vmatprep.subr.mxu1 %v1692_v24 }
 0x56c   :  { %v3261_v44 = vpop.eup %3260  ;;  %3046 = vmatpush3.msra.mxu1 %v1692_v24 }
 0x56d   :  { %3047 = vmatprep.subr.mxu1 %v1690_v60  ;;  %v735_v22 = vmul.f32 %v3261_v44, %v3997_v26  ;;  %v3263_v25 = vpop.eup %3262 }
 0x56e   :  { %3048 = vmatpush3.msra.mxu1 %v1690_v60  ;;  %v1684_v38 = vpop.permute.xlu0 %1683  ;;  %v737_v54 = vmul.f32 %v3263_v25, %v4007_v34 }
 0x56f   :  { %3009 = vmatmul.mubr.msk.f32.gmra.mxu1 %vm376_vm1, %v735_v22  ;;  %3049 = vmatprep.subr.mxu1 %v1688_v58 }
 0x570   :  { %v3265_v40 = vpop.eup %3264  ;;  %3050 = vmatpush3.msra.mxu1 %v1688_v58 }
 0x571   :  { %3051 = vmatprep.subr.mxu1 %v1686_v61  ;;  %v736_v13 = vmul.f32 %v3265_v40, %v4011_v41  ;;  %v3267_v63 = vpop.eup %3266 }
 0x572   :  { %3052 = vmatpush3.msra.mxu1 %v1686_v61  ;;  %v739_v20 = vmul.f32 %v3267_v63, %v4013_v18 }
 0x573   :  { %3011 = vmatprep.mubr.msk.f32.mxu1 %vm376_vm1, %v736_v13  ;;  %3053 = vmatprep.subr.mxu1 %v1684_v38 }
 0x574   :  { %v3269_v26 = vpop.eup %3268  ;;  %3012 = vmatmul.mubr.msk.f32.gmra.mxu1 %vm376_vm1, %v737_v54 }
 0x575   :  { %3054 = vmatpush3.msra.mxu1 %v1684_v38  ;;  %v738_v5 = vmul.f32 %v3269_v26, %v4017_v23 }
 0x576   :  { %3055 = vmatprep.subr.mxu1 %v1682_v11 }
 0x577   :  { %3056 = vmatpush3.msra.mxu1 %v1682_v11  ;;  %3014 = vmatprep.mubr.msk.f32.mxu1 %vm376_vm1, %v738_v5 }
 0x578   :  { %3015 = vmatmul.mubr.msk.f32.gmra.mxu1 %vm376_vm1, %v739_v20 }
 0x5be   :  { %v4103_v34 = vpop.f32.mrf.mxu0 }
 0x5c0   :  { %v4105_v41 = vpop.f32.mrf.mxu0 }
 0x5c2   :  { %v4107_v59 = vpop.f32.mrf.mxu0 }
 0x5c4   :  { %v4109_v21 = vpop.f32.mrf.mxu0 }
 0x5c6   :  { %v4111_v47 = vpop.f32.mrf.mxu0 }
 0x5c8   :  { %v4113_v16 = vpop.f32.mrf.mxu0 }
 0x5cc   :  { %v4115_v23 = vpop.f32.mrf.mxu0 }
 0x5ce   :  { %v4117_v18 = vpop.f32.mrf.mxu0 }
 0x5de   :  { %v3035_v27 = vpop.f32.mrf.mxu0 }
 0x5df   :  { %v4121_v50 = vsel %vm3684_vm2, %v3035_v27, -1e+30 }
 0x5e0   :  { %v1608_v32 = vsel %vm522_vm3, %v4121_v50, -inf  ;;  %v1558_v33 = vpop.f32.mrf.mxu0 }
 0x5e1   :  { %v4127_v42 = vsel %vm3688_vm4, %v1558_v33, -1e+30  ;;  %1609 = vmax.xlane.f32.xlu1 %v1608_v32 }
 0x5e2   :  { %v1605_v46 = vsel %vm522_vm3, %v4127_v42, -inf  ;;  %v3038_v28 = vpop.f32.mrf.mxu0 }
 0x5e3   :  { %v4133_v35 = vsel %vm3696_vm5, %v3038_v28, -1e+30  ;;  %1606 = vmax.xlane.f32.xlu0 %v1605_v46 }
 0x5e4   :  { %v1614_v39 = vsel %vm522_vm3, %v4133_v35, -inf  ;;  %v1568_v37 = vpop.f32.mrf.mxu0 }
 0x5e5   :  { %v4139_v52 = vsel %vm3712_vm6, %v1568_v37, -1e+30  ;;  %1615 = vmax.xlane.f32.xlu1 %v1614_v39 }
 0x5e6   :  { %v1611_v48 = vsel %vm522_vm3, %v4139_v52, -inf  ;;  %v3041_v12 = vpop.f32.mrf.mxu0 }
 0x5e7   :  { %v4145_v55 = vsel %vm3716_vm7, %v3041_v12, -1e+30  ;;  %1612 = vmax.xlane.f32.xlu0 %v1611_v48 }
 0x5e8   :  { %v1620_v14 = vsel %vm522_vm3, %v4145_v55, -inf  ;;  %v1578_v15 = vpop.f32.mrf.mxu0 }
 0x5e9   :  { %v4151_v9 = vsel %vm3730_vm8, %v1578_v15, -1e+30  ;;  %1621 = vmax.xlane.f32.xlu1 %v1620_v14 }
 0x5ea   :  { %v1617_v0 = vsel %vm522_vm3, %v4151_v9, -inf  ;;  %v3044_v60 = vpop.f32.mrf.mxu0 }
 0x5eb   :  { %v4157_v3 = vsel %vm3736_vm9, %v3044_v60, -1e+30  ;;  %1618 = vmax.xlane.f32.xlu0 %v1617_v0 }
 0x5ec   :  { %v1626_v7 = vsel %vm522_vm3, %v4157_v3, -inf  ;;  %v1588_v30 = vpop.f32.mrf.mxu0 }
 0x5ed   :  { %v4163_v53 = vsel %vm3750_vm10, %v1588_v30, -1e+30  ;;  %1627 = vmax.xlane.f32.xlu1 %v1626_v7 }
 0x5ee   :  { %v1623_v51 = vsel %vm522_vm3, %v4163_v53, -inf }
 0x5ef   :  { %1624 = vmax.xlane.f32.xlu0 %v1623_v51 }
 0x5fe   :  { %1677 = vrot.lane.b32.xlu1 %v3531_v49, %s3386_s25  ;;  %v3107_v58 = vpop.f32.mrf.mxu0 }
 0x602   :  { %2246 = vrot.lane.b32.xlu1 %v3556_v8, %s3387_s26  ;;  %v2115_v8 = vpop.f32.mrf.mxu0 }
 0x604   :  { %v3110_v43 = vpop.f32.mrf.mxu0 }
 0x605   :  { %1679 = vrot.lane.b32.xlu0 %v3535_v62, %s3386_s25  ;;  %v4207_v40 = vsel %vm3696_vm5, %v3110_v43, -1e+30 }
 0x606   :  { %2244 = vrot.lane.b32.xlu1 %v3551_v6, %s3387_s26  ;;  %v2125_v24 = vpop.f32.mrf.mxu0  ;;  %v4185_v6 = vsel %vm3688_vm4, %v2115_v8, -1e+30  ;;  %v2171_v31 = vsel %vm522_vm3, %v4207_v40, -inf }
 0x608   :  { %v3113_v44 = vpop.f32.mrf.mxu0 }
 0x609   :  { %2248 = vrot.lane.b32.xlu0 %v3562_v10, %s3387_s26  ;;  %v2162_v10 = vsel %vm522_vm3, %v4185_v6, -inf  ;;  %v4219_v38 = vsel %vm3716_vm7, %v3113_v44, -1e+30  ;;  %v1846_v44 = vld [vmem:[%s4430_s4 + $0x20] sm:$0xff] }
 0x60a   :  { %2242 = vrot.lane.b32.xlu1 %v3547_v4, %s3387_s26  ;;  %v2135_v22 = vpop.f32.mrf.mxu0  ;;  %v4191_v4 = vsel %vm3712_vm6, %v2125_v24, -1e+30  ;;  %v2177_v54 = vsel %vm522_vm3, %v4219_v38, -inf }
 0x60b   :  { %v2168_v25 = vsel %vm522_vm3, %v4191_v4, -inf  ;;  %v4201_v56 = vsel %vm3730_vm8, %v2135_v22, -1e+30 }
 0x60c   :  { %v2174_v29 = vsel %vm522_vm3, %v4201_v56, -inf }
 0x60d   :  { %2240 = vrot.lane.b32.xlu0 %v3543_v2, %s3387_s26  ;;  %v3116_v2 = vpop.f32.mrf.mxu0 }
 0x60e   :  { %2238 = vrot.lane.b32.xlu1 %v3539_v1, %s3387_s26  ;;  %v4195_v1 = vsel %vm3684_vm2, %v3107_v58, -1e+30  ;;  %v4227_v45 = vsel %vm3736_vm9, %v3116_v2, -1e+30 }
 0x60f   :  { %v2165_v61 = vsel %vm522_vm3, %v4195_v1, -inf  ;;  %v2145_v17 = vpop.f32.mrf.mxu0  ;;  %v2183_v63 = vsel %vm522_vm3, %v4227_v45, -inf }
 0x610   :  { %v4213_v13 = vsel %vm3750_vm10, %v2145_v17, -1e+30 }
 0x611   :  { %v2180_v57 = vsel %vm522_vm3, %v4213_v13, -inf }
 0x62c   :  { %2163 = vmax.xlane.f32.xlu0 %v2162_v10 }
 0x630   :  { %2169 = vmax.xlane.f32.xlu0 %v2168_v25 }
 0x632   :  { %2166 = vmax.xlane.f32.xlu1 %v2165_v61 }
 0x634   :  { %2175 = vmax.xlane.f32.xlu0 %v2174_v29 }
 0x636   :  { %2172 = vmax.xlane.f32.xlu1 %v2171_v31 }
 0x638   :  { %2181 = vmax.xlane.f32.xlu0 %v2180_v57 }
 0x63a   :  { %2178 = vmax.xlane.f32.xlu1 %v2177_v54 }
 0x63e   :  { %2184 = vmax.xlane.f32.xlu1 %v2183_v63 }
 0x66a   :  { %v1610_v19 = vpop.xlane.xlu1 %1609 }
 0x66b   :  { %v1630_v26 = vsub.f32 %v4121_v50, %v1610_v19 }
 0x66c   :  { %v1607_v11 = vpop.xlane.xlu0 %1606 }
 0x66d   :  { %v1639_v5 = vmul.f32 1.442695, %v1630_v26  ;;  %v1629_v20 = vsub.f32 %v4127_v42, %v1607_v11 }
 0x66e   :  { %v1616_v27 = vpop.xlane.xlu1 %1615 }
 0x66f   :  { %3270 = vpow2.f32 %v1639_v5  ;;  %v1637_v32 = vmul.f32 1.442695, %v1629_v20  ;;  %v1632_v33 = vsub.f32 %v4133_v35, %v1616_v27 }
 0x670   :  { %v1613_v36 = vpop.xlane.xlu0 %1612 }
 0x671   :  { %3272 = vpow2.f32 %v1637_v32  ;;  %v1643_v46 = vmul.f32 1.442695, %v1632_v33  ;;  %v1631_v28 = vsub.f32 %v4139_v52, %v1613_v36 }
 0x672   :  { %v1622_v39 = vpop.xlane.xlu1 %1621 }
 0x673   :  { %v1641_v37 = vmul.f32 1.442695, %v1631_v28  ;;  %v1634_v48 = vsub.f32 %v4145_v55, %v1622_v39  ;;  %3274 = vpow2.f32 %v1643_v46 }
 0x674   :  { %v1619_v50 = vpop.xlane.xlu0 %1618 }
 0x675   :  { %3276 = vpow2.f32 %v1641_v37  ;;  %v1647_v12 = vmul.f32 1.442695, %v1634_v48  ;;  %v1633_v42 = vsub.f32 %v4151_v9, %v1619_v50 }
 0x676   :  { %v1628_v14 = vpop.xlane.xlu1 %1627 }
 0x677   :  { %3278 = vpow2.f32 %v1647_v12  ;;  %v1645_v15 = vmul.f32 1.442695, %v1633_v42  ;;  %v1636_v35 = vsub.f32 %v4157_v3, %v1628_v14  ;;  %v1847_v3 = vld [vmem:[%s4430_s4 + $0x28] sm:$0xff] }
 0x678   :  { %v1625_v0 = vpop.xlane.xlu0 %1624 }
 0x679   :  { %3280 = vpow2.f32 %v1645_v15  ;;  %v1651_v60 = vmul.f32 1.442695, %v1636_v35  ;;  %v1635_v52 = vsub.f32 %v4163_v53, %v1625_v0 }
 0x67a   :  { %v1678_v7 = vpop.permute.xlu1 %1677 }
 0x67b   :  { %3282 = vpow2.f32 %v1651_v60  ;;  %v1649_v30 = vmul.f32 1.442695, %v1635_v52 }
 0x67c   :  { %v3271_v55 = vpop.eup %3270  ;;  %v1680_v51 = vpop.permute.xlu0 %1679 }
 0x67d   :  { %3284 = vpow2.f32 %v1649_v30  ;;  %3057 = vmatprep.subr.mxu1 %v1680_v51  ;;  %v1656_v58 = vsel %vm522_vm3, %v3271_v55, 0.0 }
 0x67e   :  { %v3273_v9 = vpop.eup %3272  ;;  %v4240_v8 = vpop.permute.xlu1 %2246  ;;  %1657 = vadd.xlane.f32.xlu1 %v1656_v58  ;;  %3058 = vmatpush3.msra.mxu1 %v1680_v51 }
 0x67f   :  { %3059 = vmatprep.subr.mxu1 %v1678_v7  ;;  %3061 = vmatprep.mubr.msk.f32.mxu1 %vm522_vm3, %v3273_v9  ;;  %v1653_v53 = vsel %vm522_vm3, %v3273_v9, 0.0 }
 0x680   :  { %1654 = vadd.xlane.f32.xlu0 %v1653_v53  ;;  %3060 = vmatpush3.msra.mxu1 %v1678_v7  ;;  %v4247_v43 = vpop.permute.xlu0 %2248  ;;  %v3275_v24 = vpop.eup %3274 }
 0x681   :  { %3062 = vmatmul.mubr.msk.f32.vlgmr.msra.gmra.mxu1 %vm522_vm3, %v3271_v55  ;;  %3073 = vmatprep.subr.mxu1 %v1847_v3  ;;  %v1662_v25 = vsel %vm522_vm3, %v3275_v24, 0.0 }
 0x682   :  { %v3277_v22 = vpop.eup %3276  ;;  %3117 = vmatprep.subr.mxu0 %v4247_v43  ;;  %v4254_v10 = vpop.permute.xlu1 %2244  ;;  %3074 = vmatpush3.msra.mxu1 %v1847_v3 }
 0x683   :  { %3118 = vmatpush3.msra.mxu0 %v4247_v43  ;;  %3064 = vmatprep.mubr.msk.f32.mxu1 %vm522_vm3, %v3277_v22  ;;  %v1659_v57 = vsel %vm522_vm3, %v3277_v22, 0.0 }
 0x684   :  { %v3279_v2 = vpop.eup %3278  ;;  %3075 = vmatprep.subr.mxu1 %v1846_v44  ;;  %3119 = vmatprep.subr.mxu0 %v4240_v8  ;;  %v4272_v19 = vpop.permute.xlu0 %2240 }
 0x685   :  { %1663 = vadd.xlane.f32.xlu0 %v1662_v25  ;;  %3120 = vmatpush3.msra.mxu0 %v4240_v8  ;;  %v1668_v61 = vsel %vm522_vm3, %v3279_v2, 0.0 }
 0x686   :  { %v3281_v17 = vpop.eup %3280  ;;  %3076 = vmatpush3.msra.mxu1 %v1846_v44  ;;  %3121 = vmatprep.subr.mxu0 %v4254_v10  ;;  %v4263_v29 = vpop.permute.xlu1 %2242 }
 0x687   :  { %3065 = vmatmul.mubr.msk.f32.gmra.mxu1 %vm522_vm3, %v3275_v24  ;;  %3161 = vmatprep.subr.mxu1 %v4247_v43  ;;  %v1665_v11 = vsel %vm522_vm3, %v3281_v17, 0.0 }
 0x688   :  { %v3283_v31 = vpop.eup %3282  ;;  %1669 = vadd.xlane.f32.xlu1 %v1668_v61  ;;  %3122 = vmatpush3.msra.mxu0 %v4254_v10 }
 0x689   :  { %3067 = vmatprep.mubr.msk.f32.mxu1 %vm522_vm3, %v3281_v17  ;;  %3123 = vmatprep.subr.mxu0 %v4263_v29  ;;  %v1674_v54 = vsel %vm522_vm3, %v3283_v31, 0.0 }
 0x68a   :  { %v3285_v63 = vpop.eup %3284  ;;  %1660 = vadd.xlane.f32.xlu0 %v1659_v57  ;;  %3124 = vmatpush3.msra.mxu0 %v4263_v29  ;;  %v4275_v26 = vpop.permute.xlu1 %2238 }
 0x68b   :  { %3068 = vmatmul.mubr.msk.f32.gmra.mxu1 %vm522_vm3, %v3279_v2  ;;  %3125 = vmatprep.subr.mxu0 %v4272_v19  ;;  %v1671_v5 = vsel %vm522_vm3, %v3285_v63, 0.0 }
 0x68c   :  { %1675 = vadd.xlane.f32.xlu1 %v1674_v54  ;;  %3126 = vmatpush3.msra.mxu0 %v4272_v19 }
 0x68d   :  { %3070 = vmatprep.mubr.msk.f32.mxu1 %vm522_vm3, %v3285_v63  ;;  %3127 = vmatprep.subr.mxu0 %v4275_v26 }
 0x68e   :  { %1666 = vadd.xlane.f32.xlu0 %v1665_v11  ;;  %3128 = vmatpush3.msra.mxu0 %v4275_v26 }
 0x68f   :  { %3071 = vmatmul.mubr.msk.f32.gmra.mxu1 %vm522_vm3, %v3283_v31 }
 0x692   :  { %1672 = vadd.xlane.f32.xlu0 %v1671_v5 }
 0x69d   :  { %2234 = vrot.lane.b32.xlu1 %v3531_v49, %s3387_s26 }
 0x6a8   :  { %2236 = vrot.lane.b32.xlu0 %v3535_v62, %s3387_s26 }
 0x6b5   :  { %v2164_v20 = vpop.xlane.xlu0 %2163 }
 0x6b6   :  { %v2186_v27 = vsub.f32 %v4185_v6, %v2164_v20  ;;  %v4334_v20 = vpop.f32.mrf.mxu1 }
 0x6b8   :  { %v2194_v32 = vmul.f32 1.442695, %v2186_v27  ;;  %v4336_v27 = vpop.f32.mrf.mxu1 }
 0x6b9   :  { %v2170_v33 = vpop.xlane.xlu0 %2169 }
 0x6ba   :  { %3286 = vpow2.f32 %v2194_v32  ;;  %v2188_v39 = vsub.f32 %v4191_v4, %v2170_v33  ;;  %v4338_v32 = vpop.f32.mrf.mxu1 }
 0x6bb   :  { %v2167_v36 = vpop.xlane.xlu1 %2166 }
 0x6bc   :  { %v2187_v46 = vsub.f32 %v4195_v1, %v2167_v36  ;;  %v2198_v50 = vmul.f32 1.442695, %v2188_v39  ;;  %v4340_v33 = vpop.f32.mrf.mxu1 }
 0x6bd   :  { %v2176_v28 = vpop.xlane.xlu0 %2175 }
 0x6be   :  { %v2196_v37 = vmul.f32 1.442695, %v2187_v46  ;;  %v2190_v62 = vsub.f32 %v4201_v56, %v2176_v28  ;;  %v4342_v36 = vpop.f32.mrf.mxu1 }
 0x6bf   :  { %v2173_v48 = vpop.xlane.xlu1 %2172 }
 0x6c0   :  { %3288 = vpow2.f32 %v2196_v37  ;;  %v2189_v49 = vsub.f32 %v4207_v40, %v2173_v48  ;;  %v2202_v15 = vmul.f32 1.442695, %v2190_v62  ;;  %v4344_v46 = vpop.f32.mrf.mxu1 }
 0x6c1   :  { %v2182_v42 = vpop.xlane.xlu0 %2181 }
 0x6c2   :  { %v2200_v12 = vmul.f32 1.442695, %v2189_v49  ;;  %v2192_v1 = vsub.f32 %v4213_v13, %v2182_v42  ;;  %v4346_v28 = vpop.f32.mrf.mxu1 }
 0x6c3   :  { %v2179_v6 = vpop.xlane.xlu1 %2178 }
 0x6c4   :  { %3290 = vpow2.f32 %v2200_v12  ;;  %v2191_v14 = vsub.f32 %v4219_v38, %v2179_v6  ;;  %v2206_v40 = vmul.f32 1.442695, %v2192_v1  ;;  %v4348_v39 = vpop.f32.mrf.mxu1 }
 0x6c5   :  { %3292 = vpow2.f32 %v2198_v50 }
 0x6c6   :  { %v2204_v35 = vmul.f32 1.442695, %v2191_v14 }
 0x6c7   :  { %v3287_v4 = vpop.eup %3286  ;;  %v2185_v0 = vpop.xlane.xlu1 %2184 }
 0x6c8   :  { %3294 = vpow2.f32 %v2204_v35  ;;  %v2193_v60 = vsub.f32 %v4227_v45, %v2185_v0  ;;  %3133 = vmatprep.mubr.msk.f32.mxu0 %vm522_vm3, %v3287_v4  ;;  %v2210_v56 = vsel %vm522_vm3, %v3287_v4, 0.0 }
 0x6c9   :  { %2211 = vadd.xlane.f32.xlu0 %v2210_v56  ;;  %3296 = vpow2.f32 %v2202_v15 }
 0x6ca   :  { %v2208_v52 = vmul.f32 1.442695, %v2193_v60 }
 0x6cc   :  { %3298 = vpow2.f32 %v2208_v52 }
 0x6cd   :  { %v3289_v38 = vpop.eup %3288  ;;  %3300 = vpow2.f32 %v2206_v40 }
 0x6ce   :  { %v2213_v7 = vsel %vm522_vm3, %v3289_v38, 0.0 }
 0x6cf   :  { %2214 = vadd.xlane.f32.xlu1 %v2213_v7 }
 0x6d1   :  { %v4301_v13 = vpop.eup %3290 }
 0x6d2   :  { %v2219_v30 = vsel %vm522_vm3, %v4301_v13, 0.0  ;;  %v4305_v45 = vpop.eup %3292 }
 0x6d3   :  { %2220 = vadd.xlane.f32.xlu0 %v2219_v30  ;;  %v2216_v58 = vsel %vm522_vm3, %v4305_v45, 0.0 }
 0x6d5   :  { %v4307_v55 = vpop.eup %3294 }
 0x6d6   :  { %v2225_v51 = vsel %vm522_vm3, %v4307_v55, 0.0  ;;  %v4313_v9 = vpop.eup %3296 }
 0x6d7   :  { %2226 = vadd.xlane.f32.xlu1 %v2225_v51  ;;  %2217 = vadd.xlane.f32.xlu0 %v2216_v58  ;;  %v2222_v24 = vsel %vm522_vm3, %v4313_v9, 0.0 }
 0x6d9   :  { %v4315_v3 = vpop.eup %3298 }
 0x6da   :  { %v2231_v53 = vsel %vm522_vm3, %v4315_v3, 0.0  ;;  %v4321_v44 = vpop.eup %3300 }
 0x6db   :  { %2232 = vadd.xlane.f32.xlu1 %v2231_v53  ;;  %2223 = vadd.xlane.f32.xlu0 %v2222_v24  ;;  %v2228_v22 = vsel %vm522_vm3, %v4321_v44, 0.0  ;;  %v1395_v24 = vadd.f32 %v4334_v20, %v4103_v34  ;;  %v1415_v20 = vadd.f32 %v4342_v36, %v4111_v47 }
 0x6df   :  { %2229 = vadd.xlane.f32.xlu0 %v2228_v22 }
 0x707   :  { %v1658_v61 = vpop.xlane.xlu1 %1657 }
 0x709   :  { %v1655_v2 = vpop.xlane.xlu0 %1654 }
 0x70a   :  { %3302 = vrcp.f32 %v1655_v2  ;;  %v1390_v2 = vadd.f32 %v4336_v27, %v4105_v41 }
 0x70b   :  { %3304 = vrcp.f32 %v1658_v61 }
 0x70e   :  { %v1664_v25 = vpop.xlane.xlu0 %1663 }
 0x711   :  { %v1670_v31 = vpop.xlane.xlu1 %1669 }
 0x713   :  { %v1661_v17 = vpop.xlane.xlu0 %1660 }
 0x714   :  { %3306 = vrcp.f32 %v1661_v17 }
 0x715   :  { %v1676_v54 = vpop.xlane.xlu1 %1675  ;;  %3308 = vrcp.f32 %v1664_v25 }
 0x717   :  { %v1667_v57 = vpop.xlane.xlu0 %1666  ;;  %v3303_v48 = vpop.eup %3302 }
 0x718   :  { %3310 = vrcp.f32 %v1667_v57  ;;  %v3305_v50 = vpop.eup %3304 }
 0x719   :  { %v4328_v5 = vpop.permute.xlu1 %2234  ;;  %3312 = vrcp.f32 %v1670_v31  ;;  %v1405_v31 = vadd.f32 %v4338_v32, %v4107_v59 }
 0x71b   :  { %v1673_v63 = vpop.xlane.xlu0 %1672 }
 0x71c   :  { %3314 = vrcp.f32 %v1673_v63  ;;  %v1400_v63 = vadd.f32 %v4340_v33, %v4109_v21  ;;  %v1425_v21 = vadd.f32 %v4346_v28, %v4115_v23 }
 0x71d   :  { %3316 = vrcp.f32 %v1676_v54 }
 0x71f   :  { %v4325_v11 = vpop.permute.xlu0 %2236 }
 0x720   :  { %3129 = vmatprep.subr.mxu0 %v4325_v11 }
 0x721   :  { %3130 = vmatpush3.msra.mxu0 %v4325_v11  ;;  %v3307_v6 = vpop.eup %3306 }
 0x722   :  { %3131 = vmatprep.subr.mxu0 %v4328_v5  ;;  %v3309_v15 = vpop.eup %3308 }
 0x723   :  { %3132 = vmatpush3.msra.mxu0 %v4328_v5 }
 0x724   :  { %3134 = vmatmul.mubr.msk.f32.vlgmr.msra.gmra.mxu0 %vm522_vm3, %v3289_v38 }
 0x725   :  { %v3311_v0 = vpop.eup %3310 }
 0x741   :  { %v3063_v37 = vpop.f32.mrf.mxu1 }
 0x742   :  { %v1839_v12 = vmul.f32 %v3305_v50, %v3063_v37  ;;  %v1410_v37 = vadd.f32 %v4344_v46, %v4113_v16 }
 0x743   :  { %v1791_v49 = vpop.f32.mrf.mxu1 }
 0x744   :  { %v1838_v62 = vmul.f32 %v3303_v48, %v1791_v49 }
 0x746   :  { %3077 = vmatprep.mubr.msk.f32.mxu1 %vm376_vm1, %v1838_v62 }
 0x747   :  { %v3066_v42 = vpop.f32.mrf.mxu1  ;;  %3078 = vmatmul.mubr.msk.f32.vlgmr.msra.gmra.mxu1 %vm376_vm1, %v1839_v12 }
 0x748   :  { %3169 = vmatpush3.msra.mxu1 %v4247_v43  ;;  %v1841_v35 = vmul.f32 %v3309_v15, %v3066_v42  ;;  %v3313_v43 = vpop.eup %3312 }
 0x749   :  { %v1801_v14 = vpop.f32.mrf.mxu1  ;;  %3162 = vmatprep.subr.mxu1 %v4240_v8  ;;  %v3315_v52 = vpop.eup %3314 }
 0x74a   :  { %v1840_v1 = vmul.f32 %v3307_v6, %v1801_v14  ;;  %3170 = vmatpush3.msra.mxu1 %v4240_v8  ;;  %v3317_v38 = vpop.eup %3316 }
 0x74b   :  { %v3069_v4 = vpop.f32.mrf.mxu1  ;;  %3163 = vmatprep.subr.mxu1 %v4254_v10 }
 0x74c   :  { %3080 = vmatprep.mubr.msk.f32.mxu1 %vm376_vm1, %v1840_v1  ;;  %3171 = vmatpush3.msra.mxu1 %v4254_v10  ;;  %v1843_v40 = vmul.f32 %v3313_v43, %v3069_v4 }
 0x74d   :  { %v1811_v60 = vpop.f32.mrf.mxu1  ;;  %3081 = vmatmul.mubr.msk.f32.gmra.mxu1 %vm376_vm1, %v1841_v35  ;;  %3164 = vmatprep.subr.mxu1 %v4263_v29 }
 0x74e   :  { %v1842_v56 = vmul.f32 %v3311_v0, %v1811_v60  ;;  %3172 = vmatpush3.msra.mxu1 %v4263_v29  ;;  %v2404_v29 = vld [vmem:[%s4430_s4 + $0x38] sm:$0xff] }
 0x74f   :  { %v3072_v8 = vpop.f32.mrf.mxu1  ;;  %3165 = vmatprep.subr.mxu1 %v4272_v19 }
 0x750   :  { %3083 = vmatprep.mubr.msk.f32.mxu1 %vm376_vm1, %v1842_v56  ;;  %3173 = vmatpush3.msra.mxu1 %v4272_v19  ;;  %v1845_v30 = vmul.f32 %v3317_v38, %v3072_v8  ;;  %v2403_v19 = vld [vmem:[%s4430_s4 + $0x30] sm:$0xff]  ;;  %s3388_s4 = smov [#allocation5]  }
 0x751   :  { %v1821_v10 = vpop.f32.mrf.mxu1  ;;  %3084 = vmatmul.mubr.msk.f32.gmra.mxu1 %vm376_vm1, %v1843_v40  ;;  %3166 = vmatprep.subr.mxu1 %v4275_v26  ;;  %s2555_s12 = sshll.u32 %s3388_s4, 4  ;;  %s2556_s12 = int_to_ptr.vmem [resolvable:$true] %s2555_s12 }
 0x752   :  { %v1844_v7 = vmul.f32 %v3315_v52, %v1821_v10  ;;  %3174 = vmatpush3.msra.mxu1 %v4275_v26  ;;  %v2212_v26 = vpop.xlane.xlu0 %2211  ;;  %s3354_s13 = scalar_lea.vmem %s2556_s12, 1024  ;;  %p3359_p6 = scmp.lt.s32.totalorder %s2556_s12, %s2556_s12 }
 0x753   :  { %3167 = vmatprep.subr.mxu1 %v4325_v11  ;;  %3318 = vrcp.f32 %v2212_v26  ;;  %p3355_p5 = scmp.ne.s32.totalorder %s2556_s12, %s3354_s13  ;;  %p3360_p7 = scmp.lt.s32.totalorder %s3354_s13, %s3354_s13 }
 0x754   :  { %3086 = vmatprep.mubr.msk.f32.mxu1 %vm376_vm1, %v1844_v7  ;;  %3175 = vmatpush3.msra.mxu1 %v4325_v11 }
 0x755   :  { %3087 = vmatmul.mubr.msk.f32.gmra.mxu1 %vm376_vm1, %v1845_v30  ;;  %3168 = vmatprep.subr.mxu1 %v4328_v5  ;;  %p3361_p8 = por %p3360_p7, %p3359_p6 }
 0x756   :  { %3136 = vmatprep.mubr.msk.f32.mxu1 %vm522_vm3, %v4305_v45  ;;  %3176 = vmatpush3.msra.mxu1 %v4328_v5 }
 0x757   :  { %3145 = vmatprep.subr.mxu1 %v2404_v29  ;;  %p3362_p9 = pnand %p3361_p8, %p3355_p5 }
 0x759   :  { %3137 = vmatmul.mubr.msk.f32.vlgmr.msra.gmra.mxu1 %vm522_vm3, %v4301_v13  ;;  %v2215_v13 = vpop.xlane.xlu1 %2214 }
 0x75a   :  { %3139 = vmatprep.mubr.msk.f32.mxu1 %vm522_vm3, %v4313_v9  ;;  %3146 = vmatpush3.msra.mxu1 %v2404_v29  ;;  %3320 = vrcp.f32 %v2215_v13 }
 0x75b   :  { %3147 = vmatprep.subr.mxu1 %v2403_v19 }
 0x75c   :  { %3148 = vmatpush3.msra.mxu1 %v2403_v19  ;;  %v2221_v53 = vpop.xlane.xlu0 %2220 }
 0x75d   :  { %3140 = vmatmul.mubr.msk.f32.gmra.mxu1 %vm522_vm3, %v4307_v55 }
 0x75e   :  { %3142 = vmatprep.mubr.msk.f32.mxu1 %vm522_vm3, %v4321_v44 }
 0x760   :  { %v3319_v55 = vpop.eup %3318  ;;  %v2218_v44 = vpop.xlane.xlu0 %2217 }
 0x761   :  { %3143 = vmatmul.mubr.msk.f32.gmra.mxu1 %vm522_vm3, %v4315_v3  ;;  %v2227_v11 = vpop.xlane.xlu1 %2226  ;;  %3322 = vrcp.f32 %v2218_v44 }
 0x762   :  { %3324 = vrcp.f32 %v2221_v53 }
 0x764   :  { %v2224_v57 = vpop.xlane.xlu0 %2223 }
 0x765   :  { %3326 = vrcp.f32 %v2224_v57  ;;  %v2233_v33 = vpop.xlane.xlu1 %2232 }
 0x766   :  { %3328 = vrcp.f32 %v2227_v11 }
 0x767   :  { %v3321_v58 = vpop.eup %3320 }
 0x768   :  { %v2230_v32 = vpop.xlane.xlu0 %2229 }
 0x769   :  { %3330 = vrcp.f32 %v2230_v32 }
 0x76a   :  { %3332 = vrcp.f32 %v2233_v33 }
 0x76e   :  { %v3323_v12 = vpop.eup %3322 }
 0x76f   :  { %v3325_v6 = vpop.eup %3324 }
 0x772   :  { %v3327_v15 = vpop.eup %3326 }
 0x773   :  { %v3329_v23 = vpop.eup %3328 }
 0x776   :  { %v3331_v0 = vpop.eup %3330 }
 0x777   :  { %v3333_v43 = vpop.eup %3332 }
 0x7e4   :  { %v3135_v45 = vpop.f32.mrf.mxu0 }
 0x7e5   :  { %v2396_v3 = vmul.f32 %v3321_v58, %v3135_v45 }
 0x7e6   :  { %v2348_v51 = vpop.f32.mrf.mxu0 }
 0x7e7   :  { %v2395_v9 = vmul.f32 %v3319_v55, %v2348_v51  ;;  %v1420_v55 = vadd.f32 %v4348_v39, %v4117_v18 }
 0x7e9   :  { %3149 = vmatprep.mubr.msk.f32.mxu1 %vm376_vm1, %v2395_v9 }
 0x7ea   :  { %3150 = vmatmul.mubr.msk.f32.vlgmr.msra.gmra.mxu1 %vm376_vm1, %v2396_v3 }
 0x807   :  { %v3079_v22 = vpop.f32.mrf.mxu1 }
 0x808   :  { %v1978_v25 = vadd.f32 %v3079_v22, %v1395_v24 }
 0x809   :  { %v1938_v61 = vpop.f32.mrf.mxu1 }
 0x80a   :  { %v1977_v17 = vadd.f32 %v1938_v61, %v1390_v2 }
 0x80d   :  { %v3082_v54 = vpop.f32.mrf.mxu1 }
 0x80e   :  { %v1980_v5 = vadd.f32 %v3082_v54, %v1405_v31 }
 0x80f   :  { %v1948_v34 = vpop.f32.mrf.mxu1 }
 0x810   :  { %v1979_v41 = vadd.f32 %v1948_v34, %v1400_v63 }
 0x811   :  { %v3085_v27 = vpop.f32.mrf.mxu1 }
 0x812   :  { %v1982_v59 = vadd.f32 %v3085_v27, %v1415_v20 }
 0x813   :  { %v1958_v48 = vpop.f32.mrf.mxu1 }
 0x814   :  { %v1981_v49 = vadd.f32 %v1958_v48, %v1410_v37 }
 0x815   :  { %v3088_v50 = vpop.f32.mrf.mxu1 }
 0x816   :  { %v1984_v62 = vadd.f32 %v3088_v50, %v1425_v21 }
 0x817   :  { %v1968_v47 = vpop.f32.mrf.mxu1 }
 0x818   :  { %v1983_v9 = vadd.f32 %v1968_v47, %v1420_v55 }
 0x819   :  { %v3138_v36 = vpop.f32.mrf.mxu1 }
 0x81a   :  { %v2398_v46 = vmul.f32 %v3325_v6, %v3138_v36 }
 0x81b   :  { %v2358_v42 = vpop.f32.mrf.mxu1 }
 0x81c   :  { %v2397_v16 = vmul.f32 %v3323_v12, %v2358_v42 }
 0x81d   :  { %v3141_v14 = vpop.f32.mrf.mxu1 }
 0x81e   :  { %3152 = vmatprep.mubr.msk.f32.mxu1 %vm376_vm1, %v2397_v16  ;;  %v2400_v35 = vmul.f32 %v3329_v23, %v3141_v14 }
 0x81f   :  { %v2368_v1 = vpop.f32.mrf.mxu1  ;;  %3153 = vmatmul.mubr.msk.f32.gmra.mxu1 %vm376_vm1, %v2398_v46 }
 0x820   :  { %v2399_v28 = vmul.f32 %v3327_v15, %v2368_v1 }
 0x821   :  { %v3144_v4 = vpop.f32.mrf.mxu1 }
 0x822   :  { %3155 = vmatprep.mubr.msk.f32.mxu1 %vm376_vm1, %v2399_v28  ;;  %v2402_v40 = vmul.f32 %v3333_v43, %v3144_v4 }
 0x823   :  { %v2378_v60 = vpop.f32.mrf.mxu1  ;;  %3156 = vmatmul.mubr.msk.f32.gmra.mxu1 %vm376_vm1, %v2400_v35 }
 0x824   :  { %v2401_v56 = vmul.f32 %v3331_v0, %v2378_v60 }
 0x826   :  { %3158 = vmatprep.mubr.msk.f32.mxu1 %vm376_vm1, %v2401_v56 }
 0x827   :  { %3159 = vmatmul.mubr.msk.f32.gmra.mxu1 %vm376_vm1, %v2402_v40 }
 0x8aa   :  { %v3151_v8 = vpop.f32.mrf.mxu1 }
 0x8ab   :  { %v2535_v52 = vadd.f32 %v3151_v8, %v1978_v25 }
 0x8ac   :  { %v2495_v10 = vpop.f32.mrf.mxu1 }
 0x8ad   :  { %2543 = vst.msk [vmem:[#allocation5 + $0x8] sm:$0xff] %vm43_vm0, %v2535_v52  ;;  %v2534_v38 = vadd.f32 %v2495_v10, %v1977_v17 }
 0x8af   :  { %2542 = vst.msk [vmem:[#allocation5] sm:$0xff] %vm43_vm0, %v2534_v38 }
 0x8df   :  { %v3154_v7 = vpop.f32.mrf.mxu1 }
 0x8e0   :  { %v2537_v30 = vadd.f32 %v3154_v7, %v1980_v5 }
 0x8e1   :  { %v2505_v29 = vpop.f32.mrf.mxu1 }
 0x8e2   :  { %2545 = vst.msk [vmem:[#allocation5 + $0x18] sm:$0xff] %vm43_vm0, %v2537_v30  ;;  %v2536_v19 = vadd.f32 %v2505_v29, %v1979_v41 }
 0x8e3   :  { %v3157_v26 = vpop.f32.mrf.mxu1 }
 0x8e4   :  { %2544 = vst.msk [vmem:[#allocation5 + $0x10] sm:$0xff] %vm43_vm0, %v2536_v19  ;;  %v2539_v13 = vadd.f32 %v3157_v26, %v1982_v59 }
 0x8e5   :  { %v2515_v45 = vpop.f32.mrf.mxu1 }
 0x8e6   :  { %2547 = vst.msk [vmem:[#allocation5 + $0x28] sm:$0xff] %vm43_vm0, %v2539_v13  ;;  %v2538_v51 = vadd.f32 %v2515_v45, %v1981_v49 }
 0x8e7   :  { %v3160_v58 = vpop.f32.mrf.mxu1 }
 0x8e8   :  { %2546 = vst.msk [vmem:[#allocation5 + $0x20] sm:$0xff] %vm43_vm0, %v2538_v51  ;;  %v2541_v3 = vadd.f32 %v3160_v58, %v1984_v62 }
 0x8e9   :  { %v2525_v53 = vpop.f32.mrf.mxu1 }
 0x8ea   :  { %2549 = vst.msk [vmem:[#allocation5 + $0x38] sm:$0xff] %vm43_vm0, %v2541_v3  ;;  %v2540_v24 = vadd.f32 %v2525_v53, %v1983_v9 }
 0x8ec   :  { %2548 = vst.msk [vmem:[#allocation5 + $0x30] sm:$0xff] %vm43_vm0, %v2540_v24 }
 0x8ed   :  { %3365 = shalt.err (!%p3362_p9)
}
 0x8ee   :  { %s3389_s14 = smov 128   ;;  %s3390_s0 = smov 8  }
 0x8ef   :  { %2561 = dma.vmem_to_hbm [thread:$0]  %s2556_s12, 1024, %s4431_s5, [#allocation4], %s3389_s14, %s3389_s14, %s3390_s0  }
 0x8f0   :  { %3376 = dma.done.wait [#allocation4], 1024  }
 0x8f1   :  { %3377 = vsyncadd [#allocation4], 4294966272 }
 0x8f2   :  { %2565 = vsyncpa [#allocation3], 1 }
 0x8f3   :  { %2566 = vsyncpa [#allocation4], 1 }

</bundles_post_ra>
